<compile_context>
chip_gen: v6e
topology: v6e:2x2x1
jax: 0.10.0
libtpu: 0.0.40
codegen_flags: <defaults>
</compile_context>

<pallas_src>
import functools

import jax
import jax.numpy as jnp
from jax import lax
from jax.experimental import pallas as pl
from jax.experimental.pallas import tpu as pltpu

BN_EPS = 1e-4
LANE = 128


def _round_up(x, m):
    return (x + m - 1) // m * m


def _vmem_budget_bytes():
    """Per-generation VMEM budget (v7x has 64 MiB, v5e/v6e 128 MiB)."""
    cap = 64 * 1024 * 1024  # conservative default if the query is unavailable
    try:
        info = pltpu.get_tpu_info()
        cap = int(getattr(info, "vmem_capacity_bytes", cap))
    except Exception:
        pass
    return min(int(cap * 0.7), 100 * 1024 * 1024)


def _choose_band_h(H, W, C, Cp, kkc, pad, budget, max_band_rows=None):
    """Largest divisor of H whose row-band fits the VMEM budget (rows % 8 == 0)."""
    if W % 8 != 0:
        return H  # banding relies on a layout-preserving (band_h, W, k) -> (rows, k) reshape
    # VMEM that does not scale with the band: bf16 padded image + weights (x2 buffers each).
    fixed = 2 * (H + 2 * pad) * (W + 2 * pad) * C * 2 + 2 * kkc * Cp * 2
    avail = max(budget // 2 - fixed, 128 * 1024)
    # Per band row: bf16 y block (x2 buffers) + lane-padded bf16 im2col scratch.
    per_bh = W * (4 * Cp + 2 * _round_up(max(kkc, LANE), LANE))
    bh_cap = max(1, avail // per_bh)
    if max_band_rows is not None:
        bh_cap = min(bh_cap, max(1, max_band_rows // W))
    for bh in range(H, 0, -1):
        if H % bh == 0 and (bh * W) % 8 == 0 and bh <= bh_cap:
            return bh
    return H  # fall back to whole-image blocks


def _conv_stats_kernel(x_ref, w_ref, y_ref, ps_ref, lhs_ref, *, band_h, W, C, KH, KW):
    """Phase 1: 3x3 conv for one row-band of one image + BN partial sums.

    x_ref  : (1, H+2p, W+2p, C)   bf16  padded NHWC image (VMEM-resident across bands)
    w_ref  : (KH*KW*C, Cp)        bf16  tap-major weights, lane-padded C_out
    y_ref  : (1, band_h*W, Cp)    bf16  conv output (pre-BN) for this band
    ps_ref : (1, 1, 2, Cp)        f32   [sum, sum-of-squares] for this (image, band)
    lhs_ref: (band_h, W, KH*KW*C) bf16  VMEM scratch: im2col LHS for the single matmul
    """
    r = pl.program_id(1)
    row0 = r * band_h
    rows = band_h * W
    kkc = KH * KW * C

    # im2col in VMEM: tap (kh, kw) occupies lanes [idx*C, (idx+1)*C).
    for kh in range(KH):
        for kw in range(KW):
            idx = kh * KW + kw
            lhs_ref[:, :, idx * C:(idx + 1) * C] = (
                x_ref[0, pl.ds(row0 + kh, band_h), pl.ds(kw, W), :])

    # Single MXU matmul, contraction K = KH*KW*C (bf16 operands, f32 accumulation).
    lhs = lhs_ref[...].reshape(rows, kkc)
    acc = jnp.dot(lhs, w_ref[...], preferred_element_type=jnp.float32)

    # BN partial sums from the f32 result (before the bf16 downcast), while resident.
    ps_ref[0, 0, 0:1, :] = jnp.sum(acc, axis=0, keepdims=True)
    ps_ref[0, 0, 1:2, :] = jnp.sum(acc * acc, axis=0, keepdims=True)

    y_ref[0] = acc.astype(y_ref.dtype)


def _bn_relu_kernel(y_ref, scale_ref, shift_ref, o_ref):
    """Phase 2: fused per-channel scale/shift + ReLU (bf16 in, f32 out)."""
    y = y_ref[...].astype(jnp.float32)
    o_ref[...] = jnp.maximum(y * scale_ref[...] + shift_ref[...], 0.0)


def conv_bn_relu_2d(x, weight, bias, gamma, beta, kernel_size=3, max_band_rows=None):
    """x: (N, C_in, H, W) f32 NCHW; weight: (C_out, C_in, KH, KW). Returns NCHW f32.

    Implements the module defaults: stride=1, dilation=1, groups=1, is_bn=True,
    is_relu=True, with training-mode batch statistics.
    """
    # NOTE: the conv bias is cancelled exactly by the training-mode BN mean subtraction,
    # so it is dropped.  This is only valid because is_bn=True with batch statistics.
    del bias

    N, C, H, W = x.shape
    C_out = weight.shape[0]
    KH = KW = kernel_size
    pad = (kernel_size - 1) // 2
    Cp = _round_up(C_out, LANE)          # lane-dense channel count
    kkc = KH * KW * C
    HW = H * W
    M = N * HW
    Hp, Wp = H + 2 * pad, W + 2 * pad

    budget = _vmem_budget_bytes()
    band_h = _choose_band_h(H, W, C, Cp, kkc, pad, budget, max_band_rows)
    R = H // band_h
    band_rows = band_h * W

    # ---- framework-boundary layout glue: NCHW -> NHWC, spatial pad, ONE bf16 cast ----
    x_nhwc = jnp.transpose(x, (0, 2, 3, 1)).astype(jnp.bfloat16)       # (N, H, W, C)
    xp = jnp.pad(x_nhwc, ((0, 0), (pad, pad), (pad, pad), (0, 0)))     # (N, Hp, Wp, C)

    # weights: (C_out, C_in, KH, KW) -> (KH*KW*C_in, Cp); row j = (kh*KW + kw)*C_in + c
    w2 = jnp.transpose(weight, (2, 3, 1, 0)).reshape(kkc, C_out)
    w2 = jnp.pad(w2, ((0, 0), (0, Cp - C_out))).astype(jnp.bfloat16)

    # ---- phase 1: conv + per-(image, band) BN partial sums ----
    flops1 = 2 * M * kkc * Cp
    bytes1 = N * Hp * Wp * C * 2 + kkc * Cp * 2 + M * Cp * 2 + N * R * 2 * Cp * 4

    kernel1 = functools.partial(
        _conv_stats_kernel, band_h=band_h, W=W, C=C, KH=KH, KW=KW)

    y_img, psums = pl.pallas_call(
        kernel1,
        out_shape=(
            jax.ShapeDtypeStruct((N, HW, Cp), jnp.bfloat16),
            jax.ShapeDtypeStruct((N, R, 2, Cp), jnp.float32),
        ),
        grid_spec=pltpu.PrefetchScalarGridSpec(
            num_scalar_prefetch=0,
            grid=(N, R),
            in_specs=[
                # Full padded image: block index is constant across bands, so it is
                # DMA'd once per image and stays VMEM-resident while bands iterate.
                pl.BlockSpec((1, Hp, Wp, C), lambda n, r: (n, 0, 0, 0)),
                # Grid-invariant weights (double-buffered by default; small).
                pl.BlockSpec((kkc, Cp), lambda n, r: (0, 0)),
            ],
            out_specs=[
                pl.BlockSpec((1, band_rows, Cp), lambda n, r: (n, r, 0)),
                pl.BlockSpec((1, 1, 2, Cp), lambda n, r: (n, r, 0, 0)),
            ],
            scratch_shapes=[pltpu.VMEM((band_h, W, kkc), jnp.bfloat16)],
        ),
        compiler_params=pltpu.CompilerParams(
            dimension_semantics=("parallel", "parallel"),
            vmem_limit_bytes=budget,
        ),
        cost_estimate=pl.CostEstimate(
            flops=int(flops1), transcendentals=0, bytes_accessed=int(bytes1)),
    )(xp, w2)

    # ---- tiny global per-channel BN statistics + folded scale/shift (plain JAX) ----
    tot = jnp.sum(psums[:, :, 0, :], axis=(0, 1))       # (Cp,)
    tot_sq = jnp.sum(psums[:, :, 1, :], axis=(0, 1))    # (Cp,)
    mean = tot / M
    # Single-pass variance in f32; clamp tiny negatives from cancellation.  If the
    # activations can have |mean| >> std, switch to a shifted / two-pass formulation.
    var = jnp.maximum(tot_sq / M - mean * mean, 0.0)
    gamma_p = jnp.pad(gamma.astype(jnp.float32), (0, Cp - C_out))
    beta_p = jnp.pad(beta.astype(jnp.float32), (0, Cp - C_out))
    scale = gamma_p * lax.rsqrt(var + BN_EPS)            # (Cp,)
    shift = beta_p - mean * scale                        # (Cp,)

    # ---- phase 2: tiled normalize + ReLU (bf16 in, f32 out, lane-dense Cp) ----
    tm = max(256, min(4096, (budget // 4) // (Cp * 6)))  # ~VMEM byte target per block
    tm = max(8, (tm // 8) * 8)
    tm = M if M <= tm else tm
    grid2 = pl.cdiv(M, tm)
    y_flat = y_img.reshape(M, Cp)

    out = pl.pallas_call(
        _bn_relu_kernel,
        out_shape=jax.ShapeDtypeStruct((M, Cp), jnp.float32),
        grid_spec=pltpu.PrefetchScalarGridSpec(
            num_scalar_prefetch=0,
            grid=(grid2,),
            in_specs=[
                pl.BlockSpec((tm, Cp), lambda i: (i, 0)),
                pl.BlockSpec((1, Cp), lambda i: (0, 0)),
                pl.BlockSpec((1, Cp), lambda i: (0, 0)),
            ],
            out_specs=pl.BlockSpec((tm, Cp), lambda i: (i, 0)),
        ),
        compiler_params=pltpu.CompilerParams(
            dimension_semantics=("parallel",),
            vmem_limit_bytes=budget,
        ),
        cost_estimate=pl.CostEstimate(
            flops=int(2 * M * Cp), transcendentals=0,
            bytes_accessed=int(M * Cp * 2 + M * Cp * 4 + 2 * Cp * 4)),
    )(y_flat, scale.reshape(1, Cp), shift.reshape(1, Cp))

    # TODO(synk): optionally fuse the channel de-pad + NHWC->NCHW transpose into phase 2
    # (channel-grouped blocks + in-kernel XLU transpose) to avoid this extra XLA pass.
    out = out.reshape(N, H, W, Cp)[:, :, :, :C_out]
    return jnp.transpose(out, (0, 3, 1, 2))


def _reference(x, weight, bias, gamma, beta):
    # Pure-JAX reference (conv + bias + training-mode BN + ReLU).
    y = lax.conv_general_dilated(
        x, weight, window_strides=(1, 1), padding=((1, 1), (1, 1)),
        dimension_numbers=("NCHW", "OIHW", "NCHW"))
    y = y + bias.reshape(1, -1, 1, 1)
    mean = jnp.mean(y, axis=(0, 2, 3), keepdims=True)
    var = jnp.mean((y - mean) ** 2, axis=(0, 2, 3), keepdims=True)
    y = (y - mean) * lax.rsqrt(var + BN_EPS)
    y = y * gamma.reshape(1, -1, 1, 1) + beta.reshape(1, -1, 1, 1)
    return jnp.maximum(y, 0.0)


if __name__ == "__main__":
    key = jax.random.PRNGKey(0)
    k_x, k_w, k_b, k_g, k_be = jax.random.split(key, 5)

    N, C_in, H, W = 2, 4, 16, 16
    C_out, K = 8, 3

    x = jax.random.normal(k_x, (N, C_in, H, W), dtype=jnp.float32)

    # Deterministic PyTorch-like init (kaiming-uniform scale for conv).
    fan_in = C_in * K * K
    bound = 1.0 / (fan_in ** 0.5)
    weight = jax.random.uniform(k_w, (C_out, C_in, K, K), jnp.float32, -bound, bound)
    bias = jax.random.uniform(k_b, (C_out,), jnp.float32, -bound, bound)
    gamma = jax.random.uniform(k_g, (C_out,), jnp.float32, 0.5, 1.5)
    beta = jax.random.uniform(k_be, (C_out,), jnp.float32, -0.5, 0.5)

    # max_band_rows=128 forces 2 row-bands per image so the halo / banding path is
    # exercised (and numerically checked) even at this small demo shape.
    fn = jax.jit(functools.partial(conv_bn_relu_2d, kernel_size=K, max_band_rows=128))
    out = jax.block_until_ready(fn(x, weight, bias, gamma, beta))

    ref = _reference(x, weight, bias, gamma, beta)
    assert out.shape == (N, C_out, H, W), out.shape
    max_err = float(jnp.max(jnp.abs(out - ref)))
    # bf16 MXU operands / bf16 intermediate (f32 accumulation) -> loose tolerance
    assert jnp.allclose(out, ref, atol=5e-2, rtol=5e-2), (
        f"mismatch vs JAX reference (max abs err {max_err})")

    print("KERNEL_OK")
</pallas_src>

<mosaic_0001>
module attributes {stable_mosaic.version = 11 : i64} {
  func.func @_conv_stats_kernel(%arg0: i32, %arg1: i32, %arg2: memref<1x18x18x4xbf16, #tpu.memory_space<vmem>>, %arg3: memref<36x128xbf16, #tpu.memory_space<vmem>>, %arg4: memref<1x128x128xbf16, #tpu.memory_space<vmem>>, %arg5: memref<1x1x2x128xf32, #tpu.memory_space<vmem>>, %arg6: memref<8x16x36xbf16, #tpu.memory_space<vmem>>) attributes {dimension_semantics = [#tpu.dimension_semantics<parallel>, #tpu.dimension_semantics<parallel>], iteration_bounds = array<i64: 2, 2>, scalar_prefetch = 0 : i64, scratch_operands = 1 : i64, tpu.core_type = #tpu.core_type<tc>, window_params = [{transform_indices = @transform_0, window_bounds = array<i64: 1, 18, 18, 4>}, {pipeline_mode = #tpu.pipeline_mode<synchronous>, transform_indices = @transform_1, window_bounds = array<i64: 36, 128>}, {transform_indices = @transform_2, window_bounds = array<i64: 1, 128, 128>}, {transform_indices = @transform_3, window_bounds = array<i64: 1, 1, 2, 128>}]} {
    %c8_i32 = arith.constant 8 : i32
    %0 = arith.muli %arg1, %c8_i32 : i32
    %c0_i32 = arith.constant 0 : i32
    %1 = arith.addi %0, %c0_i32 : i32
    %c0 = arith.constant 0 : index
    %2 = arith.index_cast %1 : i32 to index
    %c0_0 = arith.constant 0 : index
    %c0_1 = arith.constant 0 : index
    %3 = vector.load %arg2[%c0, %2, %c0_0, %c0_1] : memref<1x18x18x4xbf16, #tpu.memory_space<vmem>>, vector<1x8x16x4xbf16>
    %4 = vector.shape_cast %3 : vector<1x8x16x4xbf16> to vector<8x16x4xbf16>
    %c0_2 = arith.constant 0 : index
    %c0_3 = arith.constant 0 : index
    %c0_4 = arith.constant 0 : index
    %5 = vector.load %arg6[%c0_2, %c0_3, %c0_4] : memref<8x16x36xbf16, #tpu.memory_space<vmem>>, vector<8x16x4xbf16>
    tpu.vector_store %arg6[%c0_2, %c0_3, %c0_4], %4 {strides = array<i32>} : memref<8x16x36xbf16, #tpu.memory_space<vmem>>, vector<8x16x4xbf16>,
    %c0_i32_5 = arith.constant 0 : i32
    %6 = arith.addi %0, %c0_i32_5 : i32
    %c0_6 = arith.constant 0 : index
    %7 = arith.index_cast %6 : i32 to index
    %c1 = arith.constant 1 : index
    %c0_7 = arith.constant 0 : index
    %8 = vector.load %arg2[%c0_6, %7, %c1, %c0_7] : memref<1x18x18x4xbf16, #tpu.memory_space<vmem>>, vector<1x8x16x4xbf16>
    %9 = vector.shape_cast %8 : vector<1x8x16x4xbf16> to vector<8x16x4xbf16>
    %c0_8 = arith.constant 0 : index
    %c0_9 = arith.constant 0 : index
    %c4 = arith.constant 4 : index
    %10 = vector.load %arg6[%c0_8, %c0_9, %c4] : memref<8x16x36xbf16, #tpu.memory_space<vmem>>, vector<8x16x4xbf16>
    tpu.vector_store %arg6[%c0_8, %c0_9, %c4], %9 {strides = array<i32>} : memref<8x16x36xbf16, #tpu.memory_space<vmem>>, vector<8x16x4xbf16>,
    %c0_i32_10 = arith.constant 0 : i32
    %11 = arith.addi %0, %c0_i32_10 : i32
    %c0_11 = arith.constant 0 : index
    %12 = arith.index_cast %11 : i32 to index
    %c2 = arith.constant 2 : index
    %c0_12 = arith.constant 0 : index
    %13 = vector.load %arg2[%c0_11, %12, %c2, %c0_12] : memref<1x18x18x4xbf16, #tpu.memory_space<vmem>>, vector<1x8x16x4xbf16>
    %14 = vector.shape_cast %13 : vector<1x8x16x4xbf16> to vector<8x16x4xbf16>
    %c0_13 = arith.constant 0 : index
    %c0_14 = arith.constant 0 : index
    %c8 = arith.constant 8 : index
    %15 = vector.load %arg6[%c0_13, %c0_14, %c8] : memref<8x16x36xbf16, #tpu.memory_space<vmem>>, vector<8x16x4xbf16>
    tpu.vector_store %arg6[%c0_13, %c0_14, %c8], %14 {strides = array<i32>} : memref<8x16x36xbf16, #tpu.memory_space<vmem>>, vector<8x16x4xbf16>,
    %c1_i32 = arith.constant 1 : i32
    %16 = arith.addi %0, %c1_i32 : i32
    %c0_15 = arith.constant 0 : index
    %17 = arith.index_cast %16 : i32 to index
    %c0_16 = arith.constant 0 : index
    %c0_17 = arith.constant 0 : index
    %18 = vector.load %arg2[%c0_15, %17, %c0_16, %c0_17] : memref<1x18x18x4xbf16, #tpu.memory_space<vmem>>, vector<1x8x16x4xbf16>
    %19 = vector.shape_cast %18 : vector<1x8x16x4xbf16> to vector<8x16x4xbf16>
    %c0_18 = arith.constant 0 : index
    %c0_19 = arith.constant 0 : index
    %c12 = arith.constant 12 : index
    %20 = vector.load %arg6[%c0_18, %c0_19, %c12] : memref<8x16x36xbf16, #tpu.memory_space<vmem>>, vector<8x16x4xbf16>
    tpu.vector_store %arg6[%c0_18, %c0_19, %c12], %19 {strides = array<i32>} : memref<8x16x36xbf16, #tpu.memory_space<vmem>>, vector<8x16x4xbf16>,
    %c1_i32_20 = arith.constant 1 : i32
    %21 = arith.addi %0, %c1_i32_20 : i32
    %c0_21 = arith.constant 0 : index
    %22 = arith.index_cast %21 : i32 to index
    %c1_22 = arith.constant 1 : index
    %c0_23 = arith.constant 0 : index
    %23 = vector.load %arg2[%c0_21, %22, %c1_22, %c0_23] : memref<1x18x18x4xbf16, #tpu.memory_space<vmem>>, vector<1x8x16x4xbf16>
    %24 = vector.shape_cast %23 : vector<1x8x16x4xbf16> to vector<8x16x4xbf16>
    %c0_24 = arith.constant 0 : index
    %c0_25 = arith.constant 0 : index
    %c16 = arith.constant 16 : index
    %25 = vector.load %arg6[%c0_24, %c0_25, %c16] : memref<8x16x36xbf16, #tpu.memory_space<vmem>>, vector<8x16x4xbf16>
    tpu.vector_store %arg6[%c0_24, %c0_25, %c16], %24 {strides = array<i32>} : memref<8x16x36xbf16, #tpu.memory_space<vmem>>, vector<8x16x4xbf16>,
    %c1_i32_26 = arith.constant 1 : i32
    %26 = arith.addi %0, %c1_i32_26 : i32
    %c0_27 = arith.constant 0 : index
    %27 = arith.index_cast %26 : i32 to index
    %c2_28 = arith.constant 2 : index
    %c0_29 = arith.constant 0 : index
    %28 = vector.load %arg2[%c0_27, %27, %c2_28, %c0_29] : memref<1x18x18x4xbf16, #tpu.memory_space<vmem>>, vector<1x8x16x4xbf16>
    %29 = vector.shape_cast %28 : vector<1x8x16x4xbf16> to vector<8x16x4xbf16>
    %c0_30 = arith.constant 0 : index
    %c0_31 = arith.constant 0 : index
    %c20 = arith.constant 20 : index
    %30 = vector.load %arg6[%c0_30, %c0_31, %c20] : memref<8x16x36xbf16, #tpu.memory_space<vmem>>, vector<8x16x4xbf16>
    tpu.vector_store %arg6[%c0_30, %c0_31, %c20], %29 {strides = array<i32>} : memref<8x16x36xbf16, #tpu.memory_space<vmem>>, vector<8x16x4xbf16>,
    %c2_i32 = arith.constant 2 : i32
    %31 = arith.addi %0, %c2_i32 : i32
    %c0_32 = arith.constant 0 : index
    %32 = arith.index_cast %31 : i32 to index
    %c0_33 = arith.constant 0 : index
    %c0_34 = arith.constant 0 : index
    %33 = vector.load %arg2[%c0_32, %32, %c0_33, %c0_34] : memref<1x18x18x4xbf16, #tpu.memory_space<vmem>>, vector<1x8x16x4xbf16>
    %34 = vector.shape_cast %33 : vector<1x8x16x4xbf16> to vector<8x16x4xbf16>
    %c0_35 = arith.constant 0 : index
    %c0_36 = arith.constant 0 : index
    %c24 = arith.constant 24 : index
    %35 = vector.load %arg6[%c0_35, %c0_36, %c24] : memref<8x16x36xbf16, #tpu.memory_space<vmem>>, vector<8x16x4xbf16>
    tpu.vector_store %arg6[%c0_35, %c0_36, %c24], %34 {strides = array<i32>} : memref<8x16x36xbf16, #tpu.memory_space<vmem>>, vector<8x16x4xbf16>,
    %c2_i32_37 = arith.constant 2 : i32
    %36 = arith.addi %0, %c2_i32_37 : i32
    %c0_38 = arith.constant 0 : index
    %37 = arith.index_cast %36 : i32 to index
    %c1_39 = arith.constant 1 : index
    %c0_40 = arith.constant 0 : index
    %38 = vector.load %arg2[%c0_38, %37, %c1_39, %c0_40] : memref<1x18x18x4xbf16, #tpu.memory_space<vmem>>, vector<1x8x16x4xbf16>
    %39 = vector.shape_cast %38 : vector<1x8x16x4xbf16> to vector<8x16x4xbf16>
    %c0_41 = arith.constant 0 : index
    %c0_42 = arith.constant 0 : index
    %c28 = arith.constant 28 : index
    %40 = vector.load %arg6[%c0_41, %c0_42, %c28] : memref<8x16x36xbf16, #tpu.memory_space<vmem>>, vector<8x16x4xbf16>
    tpu.vector_store %arg6[%c0_41, %c0_42, %c28], %39 {strides = array<i32>} : memref<8x16x36xbf16, #tpu.memory_space<vmem>>, vector<8x16x4xbf16>,
    %c2_i32_43 = arith.constant 2 : i32
    %41 = arith.addi %0, %c2_i32_43 : i32
    %c0_44 = arith.constant 0 : index
    %42 = arith.index_cast %41 : i32 to index
    %c2_45 = arith.constant 2 : index
    %c0_46 = arith.constant 0 : index
    %43 = vector.load %arg2[%c0_44, %42, %c2_45, %c0_46] : memref<1x18x18x4xbf16, #tpu.memory_space<vmem>>, vector<1x8x16x4xbf16>
    %44 = vector.shape_cast %43 : vector<1x8x16x4xbf16> to vector<8x16x4xbf16>
    %c0_47 = arith.constant 0 : index
    %c0_48 = arith.constant 0 : index
    %c32 = arith.constant 32 : index
    %45 = vector.load %arg6[%c0_47, %c0_48, %c32] : memref<8x16x36xbf16, #tpu.memory_space<vmem>>, vector<8x16x4xbf16>
    tpu.vector_store %arg6[%c0_47, %c0_48, %c32], %44 {strides = array<i32>} : memref<8x16x36xbf16, #tpu.memory_space<vmem>>, vector<8x16x4xbf16>,
    %c0_49 = arith.constant 0 : index
    %c0_50 = arith.constant 0 : index
    %c0_51 = arith.constant 0 : index
    %46 = vector.load %arg6[%c0_49, %c0_50, %c0_51] : memref<8x16x36xbf16, #tpu.memory_space<vmem>>, vector<8x16x36xbf16>
    %47 = vector.shape_cast %46 : vector<8x16x36xbf16> to vector<128x36xbf16>
    %c0_52 = arith.constant 0 : index
    %c0_53 = arith.constant 0 : index
    %48 = vector.load %arg3[%c0_52, %c0_53] : memref<36x128xbf16, #tpu.memory_space<vmem>>, vector<36x128xbf16>
    %cst = arith.constant dense<0.000000e+00> : vector<128x128xf32>
    %49 = tpu.matmul %47, %48, %cst {dimension_numbers = #tpu.dot_dimension_numbers<[1], [0], [0], [1], [0, 0, 1, 1], [], []>} : vector<128x36xbf16>, vector<36x128xbf16>, vector<128x128xf32> -> vector<128x128xf32>
    %cst_54 = arith.constant dense<0.000000e+00> : vector<128xf32>
    %50 = vector.multi_reduction <add>, %49, %cst_54 [0] : vector<128x128xf32> to vector<128xf32>
    %51 = vector.shape_cast %50 : vector<128xf32> to vector<1x128xf32>
    %c0_55 = arith.constant 0 : index
    %c0_56 = arith.constant 0 : index
    %c0_57 = arith.constant 0 : index
    %c0_58 = arith.constant 0 : index
    %52 = vector.load %arg5[%c0_55, %c0_56, %c0_57, %c0_58] : memref<1x1x2x128xf32, #tpu.memory_space<vmem>>, vector<1x1x1x128xf32>
    %53 = vector.shape_cast %52 : vector<1x1x1x128xf32> to vector<1x128xf32>
    %54 = vector.shape_cast %51 : vector<1x128xf32> to vector<1x1x1x128xf32>
    tpu.vector_store %arg5[%c0_55, %c0_56, %c0_57, %c0_58], %54 {strides = array<i32>} : memref<1x1x2x128xf32, #tpu.memory_space<vmem>>, vector<1x1x1x128xf32>,
    %55 = arith.mulf %49, %49 : vector<128x128xf32>
    %cst_59 = arith.constant dense<0.000000e+00> : vector<128xf32>
    %56 = vector.multi_reduction <add>, %55, %cst_59 [0] : vector<128x128xf32> to vector<128xf32>
    %57 = vector.shape_cast %56 : vector<128xf32> to vector<1x128xf32>
    %c0_60 = arith.constant 0 : index
    %c0_61 = arith.constant 0 : index
    %c1_62 = arith.constant 1 : index
    %c0_63 = arith.constant 0 : index
    %58 = vector.load %arg5[%c0_60, %c0_61, %c1_62, %c0_63] : memref<1x1x2x128xf32, #tpu.memory_space<vmem>>, vector<1x1x1x128xf32>
    %59 = vector.shape_cast %58 : vector<1x1x1x128xf32> to vector<1x128xf32>
    %60 = vector.shape_cast %57 : vector<1x128xf32> to vector<1x1x1x128xf32>
    tpu.vector_store %arg5[%c0_60, %c0_61, %c1_62, %c0_63], %60 {strides = array<i32>} : memref<1x1x2x128xf32, #tpu.memory_space<vmem>>, vector<1x1x1x128xf32>,
    %61 = arith.truncf %49 : vector<128x128xf32> to vector<128x128xbf16>
    %c0_64 = arith.constant 0 : index
    %c0_65 = arith.constant 0 : index
    %c0_66 = arith.constant 0 : index
    %62 = vector.load %arg4[%c0_64, %c0_65, %c0_66] : memref<1x128x128xbf16, #tpu.memory_space<vmem>>, vector<1x128x128xbf16>
    %63 = vector.shape_cast %62 : vector<1x128x128xbf16> to vector<128x128xbf16>
    %64 = vector.shape_cast %61 : vector<128x128xbf16> to vector<1x128x128xbf16>
    tpu.vector_store %arg4[%c0_64, %c0_65, %c0_66], %64 {strides = array<i32>} : memref<1x128x128xbf16, #tpu.memory_space<vmem>>, vector<1x128x128xbf16>,
    return
  }
  func.func @transform_0(%arg0: i32, %arg1: i32) -> (i32, i32, i32, i32) {
    %c0_i32 = arith.constant 0 : i32
    %c0_i32_0 = arith.constant 0 : i32
    %c0_i32_1 = arith.constant 0 : i32
    %c0_i32_2 = arith.constant 0 : i32
    return %arg0, %c0_i32, %c0_i32_0, %c0_i32_1 : i32, i32, i32, i32
  }
  func.func @transform_1(%arg0: i32, %arg1: i32) -> (i32, i32) {
    %c0_i32 = arith.constant 0 : i32
    %c0_i32_0 = arith.constant 0 : i32
    %c0_i32_1 = arith.constant 0 : i32
    return %c0_i32, %c0_i32_0 : i32, i32
  }
  func.func @transform_2(%arg0: i32, %arg1: i32) -> (i32, i32, i32) {
    %c0_i32 = arith.constant 0 : i32
    %c0_i32_0 = arith.constant 0 : i32
    return %arg0, %arg1, %c0_i32 : i32, i32, i32
  }
  func.func @transform_3(%arg0: i32, %arg1: i32) -> (i32, i32, i32, i32) {
    %c0_i32 = arith.constant 0 : i32
    %c0_i32_0 = arith.constant 0 : i32
    %c0_i32_1 = arith.constant 0 : i32
    return %arg0, %arg1, %c0_i32, %c0_i32_0 : i32, i32, i32, i32
  }
}

module attributes {stable_mosaic.version = 11 : i64} {
  func.func @_bn_relu_kernel(%arg0: i32, %arg1: memref<512x128xbf16, #tpu.memory_space<vmem>>, %arg2: memref<1x128xf32, #tpu.memory_space<vmem>>, %arg3: memref<1x128xf32, #tpu.memory_space<vmem>>, %arg4: memref<512x128xf32, #tpu.memory_space<vmem>>) attributes {dimension_semantics = [#tpu.dimension_semantics<parallel>], iteration_bounds = array<i64: 1>, scalar_prefetch = 0 : i64, scratch_operands = 0 : i64, tpu.core_type = #tpu.core_type<tc>, window_params = [{transform_indices = @transform_0, window_bounds = array<i64: 512, 128>}, {pipeline_mode = #tpu.pipeline_mode<synchronous>, transform_indices = @transform_1, window_bounds = array<i64: 1, 128>}, {pipeline_mode = #tpu.pipeline_mode<synchronous>, transform_indices = @transform_2, window_bounds = array<i64: 1, 128>}, {transform_indices = @transform_3, window_bounds = array<i64: 512, 128>}]} {
    %c0 = arith.constant 0 : index
    %c0_0 = arith.constant 0 : index
    %0 = vector.load %arg1[%c0, %c0_0] : memref<512x128xbf16, #tpu.memory_space<vmem>>, vector<512x128xbf16>
    %1 = arith.extf %0 : vector<512x128xbf16> to vector<512x128xf32>
    %c0_1 = arith.constant 0 : index
    %c0_2 = arith.constant 0 : index
    %2 = vector.load %arg2[%c0_1, %c0_2] : memref<1x128xf32, #tpu.memory_space<vmem>>, vector<1x128xf32>
    %3 = vector.broadcast %2 : vector<1x128xf32> to vector<512x128xf32>
    %4 = arith.mulf %1, %3 : vector<512x128xf32>
    %c0_3 = arith.constant 0 : index
    %c0_4 = arith.constant 0 : index
    %5 = vector.load %arg3[%c0_3, %c0_4] : memref<1x128xf32, #tpu.memory_space<vmem>>, vector<1x128xf32>
    %6 = vector.broadcast %5 : vector<1x128xf32> to vector<512x128xf32>
    %7 = arith.addf %4, %6 : vector<512x128xf32>
    %cst = arith.constant 0.000000e+00 : f32
    %8 = vector.broadcast %cst : f32 to vector<512x128xf32>
    %9 = arith.maximumf %7, %8 : vector<512x128xf32>
    %c0_5 = arith.constant 0 : index
    %c0_6 = arith.constant 0 : index
    %10 = vector.load %arg4[%c0_5, %c0_6] : memref<512x128xf32, #tpu.memory_space<vmem>>, vector<512x128xf32>
    tpu.vector_store %arg4[%c0_5, %c0_6], %9 {strides = array<i32>} : memref<512x128xf32, #tpu.memory_space<vmem>>, vector<512x128xf32>,
    return
  }
  func.func @transform_0(%arg0: i32) -> (i32, i32) {
    %c0_i32 = arith.constant 0 : i32
    %c0_i32_0 = arith.constant 0 : i32
    return %arg0, %c0_i32 : i32, i32
  }
  func.func @transform_1(%arg0: i32) -> (i32, i32) {
    %c0_i32 = arith.constant 0 : i32
    %c0_i32_0 = arith.constant 0 : i32
    %c0_i32_1 = arith.constant 0 : i32
    return %c0_i32, %c0_i32_0 : i32, i32
  }
  func.func @transform_2(%arg0: i32) -> (i32, i32) {
    %c0_i32 = arith.constant 0 : i32
    %c0_i32_0 = arith.constant 0 : i32
    %c0_i32_1 = arith.constant 0 : i32
    return %c0_i32, %c0_i32_0 : i32, i32
  }
  func.func @transform_3(%arg0: i32) -> (i32, i32) {
    %c0_i32 = arith.constant 0 : i32
    %c0_i32_0 = arith.constant 0 : i32
    return %arg0, %c0_i32 : i32, i32
  }
}

</mosaic_0001>

<bundles_post_ra>
// kernel: conv_bn_relu_2d.3
= control target key start
LH: loop header
LB: loop body
LE: loop exit
PB: predicated region body
PF: predicated region fallthrough
CT: control target
= control target key end

     0   :  { %s1023_s0 = inlined_call_operand.vmem [shape: bf16[512,128], index: 0, kind: input, shape index: {}]   ;;  %s1024_s1 = inlined_call_operand.vmem [shape: f32[1,128], index: 1, kind: input, shape index: {}]   ;;  %s1025_s2 = inlined_call_operand.vmem [shape: f32[1,128], index: 2, kind: input, shape index: {}]   ;;  %s1026_s3 = inlined_call_operand.vmem [shape: f32[512,128], index: 3, kind: output, shape index: {}]  }
   0x1   :  { %v419_v0 = vld [vmem:[%s1023_s0] sm:$0xff]   ;;  %v546_v4 = vld [vmem:[%s1023_s0 + $0x8] sm:$0xff]   ;;  %v547_v5 = vld [vmem:[%s1023_s0 + $0x10] sm:$0xff]  }
   0x2   :  { %v603_v1 = vld [vmem:[%s1024_s1] ss:$0 sm:$0xff]  ;;  %v420_v2 = vunpack.c.l.bf16 %v419_v0  ;;  %v421_v3 = vunpack.c.h.bf16 %v419_v0  ;;  %v548_v6 = vld [vmem:[%s1023_s0 + $0x18] sm:$0xff]   ;;  %v424_v8 = vunpack.c.l.bf16 %v546_v4  ;;  %v425_v9 = vunpack.c.h.bf16 %v546_v4  ;;  %v550_v33 = vld [vmem:[%s1023_s0 + $0x28] sm:$0xff]  }
   0x3   :  { %v617_v7 = vld [vmem:[%s1025_s2] ss:$0 sm:$0xff]  ;;  %v428_v10 = vunpack.c.l.bf16 %v547_v5  ;;  %v429_v11 = vunpack.c.h.bf16 %v547_v5  ;;  %v432_v14 = vunpack.c.l.bf16 %v548_v6  ;;  %v433_v15 = vunpack.c.h.bf16 %v548_v6  ;;  %v551_v34 = vld [vmem:[%s1023_s0 + $0x30] sm:$0xff]   ;;  %v552_v39 = vld [vmem:[%s1023_s0 + $0x38] sm:$0xff]  }
   0x4   :  { %v149_v12 = vmul.f32 %v420_v2, %v603_v1  ;;  %v150_v13 = vmul.f32 %v421_v3, %v603_v1  ;;  %v151_v16 = vmul.f32 %v424_v8, %v603_v1  ;;  %v152_v17 = vmul.f32 %v425_v9, %v603_v1  ;;  %v549_v28 = vld [vmem:[%s1023_s0 + $0x20] sm:$0xff]   ;;  %v554_v6 = vld [vmem:[%s1023_s0 + $0x48] sm:$0xff]   ;;  %v555_v8 = vld [vmem:[%s1023_s0 + $0x50] sm:$0xff]  }
   0x5   :  { %v153_v18 = vmul.f32 %v428_v10, %v603_v1  ;;  %v154_v19 = vmul.f32 %v429_v11, %v603_v1  ;;  %v155_v22 = vmul.f32 %v432_v14, %v603_v1  ;;  %v156_v23 = vmul.f32 %v433_v15, %v603_v1  ;;  %v553_v0 = vld [vmem:[%s1023_s0 + $0x40] sm:$0xff]  }
   0x6   :  { %v220_v20 = vadd.f32 %v617_v7, %v149_v12  ;;  %v221_v21 = vadd.f32 %v617_v7, %v150_v13  ;;  %v222_v24 = vadd.f32 %v617_v7, %v151_v16  ;;  %v223_v25 = vadd.f32 %v617_v7, %v152_v17  ;;  %v556_v13 = vld [vmem:[%s1023_s0 + $0x58] sm:$0xff]  }
   0x7   :  { %v224_v26 = vadd.f32 %v617_v7, %v153_v18  ;;  %v225_v27 = vadd.f32 %v617_v7, %v154_v19  ;;  %v226_v31 = vadd.f32 %v617_v7, %v155_v22  ;;  %v227_v32 = vadd.f32 %v617_v7, %v156_v23 }
   0x8   :  { %v284_v29 = vmax.f32 %v220_v20, 0.0  ;;  %v285_v30 = vmax.f32 %v221_v21, 0.0  ;;  %v286_v35 = vmax.f32 %v222_v24, 0.0  ;;  %v287_v36 = vmax.f32 %v223_v25, 0.0 }
   0x9   :  { %v288_v37 = vmax.f32 %v224_v26, 0.0  ;;  %v289_v38 = vmax.f32 %v225_v27, 0.0  ;;  %v290_v40 = vmax.f32 %v226_v31, 0.0  ;;  %v291_v41 = vmax.f32 %v227_v32, 0.0 }
   0xa   :  { %348 = vst [vmem:[%s1026_s3] sm:$0xff] %v284_v29  ;;  %349 = vst [vmem:[%s1026_s3 + $0x8] sm:$0xff] %v285_v30  ;;  %v436_v42 = vunpack.c.l.bf16 %v549_v28  ;;  %v437_v43 = vunpack.c.h.bf16 %v549_v28  ;;  %v440_v44 = vunpack.c.l.bf16 %v550_v33  ;;  %v441_v45 = vunpack.c.h.bf16 %v550_v33 }
   0xb   :  { %350 = vst [vmem:[%s1026_s3 + $0x10] sm:$0xff] %v286_v35  ;;  %351 = vst [vmem:[%s1026_s3 + $0x18] sm:$0xff] %v287_v36  ;;  %v444_v46 = vunpack.c.l.bf16 %v551_v34  ;;  %v445_v47 = vunpack.c.h.bf16 %v551_v34  ;;  %v448_v50 = vunpack.c.l.bf16 %v552_v39  ;;  %v449_v51 = vunpack.c.h.bf16 %v552_v39 }
   0xc   :  { %352 = vst [vmem:[%s1026_s3 + $0x20] sm:$0xff] %v288_v37  ;;  %353 = vst [vmem:[%s1026_s3 + $0x28] sm:$0xff] %v289_v38  ;;  %v157_v48 = vmul.f32 %v436_v42, %v603_v1  ;;  %v158_v49 = vmul.f32 %v437_v43, %v603_v1  ;;  %v159_v52 = vmul.f32 %v440_v44, %v603_v1  ;;  %v452_v16 = vunpack.c.l.bf16 %v553_v0  ;;  %v557_v38 = vld [vmem:[%s1023_s0 + $0x60] sm:$0xff]   ;;  %v558_v43 = vld [vmem:[%s1023_s0 + $0x68] sm:$0xff]  }
   0xd   :  { %354 = vst [vmem:[%s1026_s3 + $0x30] sm:$0xff] %v290_v40  ;;  %355 = vst [vmem:[%s1026_s3 + $0x38] sm:$0xff] %v291_v41  ;;  %v160_v53 = vmul.f32 %v441_v45, %v603_v1  ;;  %v161_v54 = vmul.f32 %v444_v46, %v603_v1  ;;  %v162_v55 = vmul.f32 %v445_v47, %v603_v1  ;;  %v453_v17 = vunpack.c.h.bf16 %v553_v0  ;;  %v559_v44 = vld [vmem:[%s1023_s0 + $0x70] sm:$0xff]  }
   0xe   :  { %v228_v56 = vadd.f32 %v617_v7, %v157_v48  ;;  %v229_v57 = vadd.f32 %v617_v7, %v158_v49  ;;  %v163_v58 = vmul.f32 %v448_v50, %v603_v1  ;;  %v164_v59 = vmul.f32 %v449_v51, %v603_v1  ;;  %v560_v49 = vld [vmem:[%s1023_s0 + $0x78] sm:$0xff]  }
   0xf   :  { %v230_v60 = vadd.f32 %v617_v7, %v159_v52  ;;  %v231_v61 = vadd.f32 %v617_v7, %v160_v53  ;;  %v232_v62 = vadd.f32 %v617_v7, %v161_v54  ;;  %v233_v63 = vadd.f32 %v617_v7, %v162_v55 }
  0x10   :  { %v292_v2 = vmax.f32 %v228_v56, 0.0  ;;  %v293_v3 = vmax.f32 %v229_v57, 0.0  ;;  %v234_v4 = vadd.f32 %v617_v7, %v163_v58  ;;  %v235_v5 = vadd.f32 %v617_v7, %v164_v59 }
  0x11   :  { %v294_v9 = vmax.f32 %v230_v60, 0.0  ;;  %v295_v10 = vmax.f32 %v231_v61, 0.0  ;;  %v296_v11 = vmax.f32 %v232_v62, 0.0  ;;  %v297_v12 = vmax.f32 %v233_v63, 0.0 }
  0x12   :  { %356 = vst [vmem:[%s1026_s3 + $0x40] sm:$0xff] %v292_v2  ;;  %357 = vst [vmem:[%s1026_s3 + $0x48] sm:$0xff] %v293_v3  ;;  %v298_v14 = vmax.f32 %v234_v4, 0.0  ;;  %v299_v15 = vmax.f32 %v235_v5, 0.0  ;;  %v456_v18 = vunpack.c.l.bf16 %v554_v6  ;;  %v457_v19 = vunpack.c.h.bf16 %v554_v6 }
  0x13   :  { %358 = vst [vmem:[%s1026_s3 + $0x50] sm:$0xff] %v294_v9  ;;  %359 = vst [vmem:[%s1026_s3 + $0x58] sm:$0xff] %v295_v10  ;;  %v460_v20 = vunpack.c.l.bf16 %v555_v8  ;;  %v461_v21 = vunpack.c.h.bf16 %v555_v8  ;;  %v165_v22 = vmul.f32 %v452_v16, %v603_v1  ;;  %v166_v23 = vmul.f32 %v453_v17, %v603_v1  ;;  %v562_v17 = vld [vmem:[%s1023_s0 + $0x88] sm:$0xff]  }
  0x14   :  { %360 = vst [vmem:[%s1026_s3 + $0x60] sm:$0xff] %v296_v11  ;;  %361 = vst [vmem:[%s1026_s3 + $0x68] sm:$0xff] %v297_v12  ;;  %v464_v24 = vunpack.c.l.bf16 %v556_v13  ;;  %v465_v25 = vunpack.c.h.bf16 %v556_v13  ;;  %v167_v26 = vmul.f32 %v456_v18, %v603_v1  ;;  %v168_v27 = vmul.f32 %v457_v19, %v603_v1  ;;  %v561_v12 = vld [vmem:[%s1023_s0 + $0x80] sm:$0xff]   ;;  %v563_v18 = vld [vmem:[%s1023_s0 + $0x90] sm:$0xff]  }
  0x15   :  { %362 = vst [vmem:[%s1026_s3 + $0x70] sm:$0xff] %v298_v14  ;;  %363 = vst [vmem:[%s1026_s3 + $0x78] sm:$0xff] %v299_v15  ;;  %v169_v28 = vmul.f32 %v460_v20, %v603_v1  ;;  %v170_v29 = vmul.f32 %v461_v21, %v603_v1  ;;  %v236_v30 = vadd.f32 %v617_v7, %v165_v22  ;;  %v468_v52 = vunpack.c.l.bf16 %v557_v38 }
  0x16   :  { %v237_v31 = vadd.f32 %v617_v7, %v166_v23  ;;  %v171_v32 = vmul.f32 %v464_v24, %v603_v1  ;;  %v172_v33 = vmul.f32 %v465_v25, %v603_v1  ;;  %v238_v34 = vadd.f32 %v617_v7, %v167_v26  ;;  %v564_v23 = vld [vmem:[%s1023_s0 + $0x98] sm:$0xff]  }
  0x17   :  { %v239_v35 = vadd.f32 %v617_v7, %v168_v27  ;;  %v240_v36 = vadd.f32 %v617_v7, %v169_v28  ;;  %v241_v37 = vadd.f32 %v617_v7, %v170_v29  ;;  %v300_v39 = vmax.f32 %v236_v30, 0.0 }
  0x18   :  { %v301_v40 = vmax.f32 %v237_v31, 0.0  ;;  %v242_v41 = vadd.f32 %v617_v7, %v171_v32  ;;  %v243_v42 = vadd.f32 %v617_v7, %v172_v33  ;;  %v302_v45 = vmax.f32 %v238_v34, 0.0 }
  0x19   :  { %v303_v46 = vmax.f32 %v239_v35, 0.0  ;;  %v304_v47 = vmax.f32 %v240_v36, 0.0  ;;  %v305_v48 = vmax.f32 %v241_v37, 0.0  ;;  %364 = vst [vmem:[%s1026_s3 + $0x80] sm:$0xff] %v300_v39  ;;  %v469_v53 = vunpack.c.h.bf16 %v557_v38 }
  0x1a   :  { %365 = vst [vmem:[%s1026_s3 + $0x88] sm:$0xff] %v301_v40  ;;  %v306_v50 = vmax.f32 %v242_v41, 0.0  ;;  %v307_v51 = vmax.f32 %v243_v42, 0.0  ;;  %366 = vst [vmem:[%s1026_s3 + $0x90] sm:$0xff] %v302_v45  ;;  %v472_v54 = vunpack.c.l.bf16 %v558_v43  ;;  %v473_v55 = vunpack.c.h.bf16 %v558_v43 }
  0x1b   :  { %367 = vst [vmem:[%s1026_s3 + $0x98] sm:$0xff] %v303_v46  ;;  %368 = vst [vmem:[%s1026_s3 + $0xa0] sm:$0xff] %v304_v47  ;;  %v476_v56 = vunpack.c.l.bf16 %v559_v44  ;;  %v477_v57 = vunpack.c.h.bf16 %v559_v44  ;;  %v173_v58 = vmul.f32 %v468_v52, %v603_v1  ;;  %v174_v59 = vmul.f32 %v469_v53, %v603_v1  ;;  %v566_v53 = vld [vmem:[%s1023_s0 + $0xa8] sm:$0xff]  }
  0x1c   :  { %369 = vst [vmem:[%s1026_s3 + $0xa8] sm:$0xff] %v305_v48  ;;  %370 = vst [vmem:[%s1026_s3 + $0xb0] sm:$0xff] %v306_v50  ;;  %v480_v60 = vunpack.c.l.bf16 %v560_v49  ;;  %v481_v61 = vunpack.c.h.bf16 %v560_v49  ;;  %v175_v62 = vmul.f32 %v472_v54, %v603_v1  ;;  %v176_v63 = vmul.f32 %v473_v55, %v603_v1  ;;  %v565_v48 = vld [vmem:[%s1023_s0 + $0xa0] sm:$0xff]   ;;  %v567_v54 = vld [vmem:[%s1023_s0 + $0xb0] sm:$0xff]  }
  0x1d   :  { %371 = vst [vmem:[%s1026_s3 + $0xb8] sm:$0xff] %v307_v51  ;;  %v177_v0 = vmul.f32 %v476_v56, %v603_v1  ;;  %v178_v2 = vmul.f32 %v477_v57, %v603_v1  ;;  %v244_v3 = vadd.f32 %v617_v7, %v173_v58  ;;  %v245_v4 = vadd.f32 %v617_v7, %v174_v59  ;;  %v568_v59 = vld [vmem:[%s1023_s0 + $0xb8] sm:$0xff]  }
  0x1e   :  { %v179_v5 = vmul.f32 %v480_v60, %v603_v1  ;;  %v180_v6 = vmul.f32 %v481_v61, %v603_v1  ;;  %v246_v8 = vadd.f32 %v617_v7, %v175_v62  ;;  %v247_v9 = vadd.f32 %v617_v7, %v176_v63 }
  0x1f   :  { %v248_v10 = vadd.f32 %v617_v7, %v177_v0  ;;  %v249_v11 = vadd.f32 %v617_v7, %v178_v2  ;;  %v308_v13 = vmax.f32 %v244_v3, 0.0  ;;  %v309_v14 = vmax.f32 %v245_v4, 0.0 }
  0x20   :  { %v250_v15 = vadd.f32 %v617_v7, %v179_v5  ;;  %v251_v16 = vadd.f32 %v617_v7, %v180_v6  ;;  %v310_v19 = vmax.f32 %v246_v8, 0.0  ;;  %v311_v20 = vmax.f32 %v247_v9, 0.0 }
  0x21   :  { %v312_v21 = vmax.f32 %v248_v10, 0.0  ;;  %v313_v22 = vmax.f32 %v249_v11, 0.0  ;;  %372 = vst [vmem:[%s1026_s3 + $0xc0] sm:$0xff] %v308_v13  ;;  %373 = vst [vmem:[%s1026_s3 + $0xc8] sm:$0xff] %v309_v14  ;;  %v484_v26 = vunpack.c.l.bf16 %v561_v12  ;;  %v485_v27 = vunpack.c.h.bf16 %v561_v12 }
  0x22   :  { %v314_v24 = vmax.f32 %v250_v15, 0.0  ;;  %v315_v25 = vmax.f32 %v251_v16, 0.0  ;;  %374 = vst [vmem:[%s1026_s3 + $0xd0] sm:$0xff] %v310_v19  ;;  %375 = vst [vmem:[%s1026_s3 + $0xd8] sm:$0xff] %v311_v20  ;;  %v488_v28 = vunpack.c.l.bf16 %v562_v17  ;;  %v489_v29 = vunpack.c.h.bf16 %v562_v17 }
  0x23   :  { %376 = vst [vmem:[%s1026_s3 + $0xe0] sm:$0xff] %v312_v21  ;;  %377 = vst [vmem:[%s1026_s3 + $0xe8] sm:$0xff] %v313_v22  ;;  %v492_v30 = vunpack.c.l.bf16 %v563_v18  ;;  %v493_v31 = vunpack.c.h.bf16 %v563_v18  ;;  %v181_v32 = vmul.f32 %v484_v26, %v603_v1  ;;  %v182_v33 = vmul.f32 %v485_v27, %v603_v1  ;;  %v569_v22 = vld [vmem:[%s1023_s0 + $0xc0] sm:$0xff]   ;;  %v570_v27 = vld [vmem:[%s1023_s0 + $0xc8] sm:$0xff]  }
  0x24   :  { %378 = vst [vmem:[%s1026_s3 + $0xf0] sm:$0xff] %v314_v24  ;;  %379 = vst [vmem:[%s1026_s3 + $0xf8] sm:$0xff] %v315_v25  ;;  %v496_v34 = vunpack.c.l.bf16 %v564_v23  ;;  %v497_v35 = vunpack.c.h.bf16 %v564_v23  ;;  %v183_v36 = vmul.f32 %v488_v28, %v603_v1  ;;  %v184_v37 = vmul.f32 %v489_v29, %v603_v1  ;;  %v571_v28 = vld [vmem:[%s1023_s0 + $0xd0] sm:$0xff]  }
  0x25   :  { %v185_v38 = vmul.f32 %v492_v30, %v603_v1  ;;  %v186_v39 = vmul.f32 %v493_v31, %v603_v1  ;;  %v252_v40 = vadd.f32 %v617_v7, %v181_v32  ;;  %v253_v41 = vadd.f32 %v617_v7, %v182_v33  ;;  %v572_v33 = vld [vmem:[%s1023_s0 + $0xd8] sm:$0xff]  }
  0x26   :  { %v187_v42 = vmul.f32 %v496_v34, %v603_v1  ;;  %v188_v43 = vmul.f32 %v497_v35, %v603_v1  ;;  %v254_v44 = vadd.f32 %v617_v7, %v183_v36  ;;  %v255_v45 = vadd.f32 %v617_v7, %v184_v37 }
  0x27   :  { %v256_v46 = vadd.f32 %v617_v7, %v185_v38  ;;  %v257_v47 = vadd.f32 %v617_v7, %v186_v39  ;;  %v316_v49 = vmax.f32 %v252_v40, 0.0  ;;  %v317_v50 = vmax.f32 %v253_v41, 0.0 }
  0x28   :  { %v258_v51 = vadd.f32 %v617_v7, %v187_v42  ;;  %v259_v52 = vadd.f32 %v617_v7, %v188_v43  ;;  %v318_v55 = vmax.f32 %v254_v44, 0.0  ;;  %v319_v56 = vmax.f32 %v255_v45, 0.0 }
  0x29   :  { %v320_v57 = vmax.f32 %v256_v46, 0.0  ;;  %v321_v58 = vmax.f32 %v257_v47, 0.0  ;;  %380 = vst [vmem:[%s1026_s3 + $0x100] sm:$0xff] %v316_v49  ;;  %381 = vst [vmem:[%s1026_s3 + $0x108] sm:$0xff] %v317_v50  ;;  %v500_v62 = vunpack.c.l.bf16 %v565_v48  ;;  %v501_v63 = vunpack.c.h.bf16 %v565_v48 }
  0x2a   :  { %v322_v60 = vmax.f32 %v258_v51, 0.0  ;;  %v323_v61 = vmax.f32 %v259_v52, 0.0  ;;  %382 = vst [vmem:[%s1026_s3 + $0x110] sm:$0xff] %v318_v55  ;;  %383 = vst [vmem:[%s1026_s3 + $0x118] sm:$0xff] %v319_v56  ;;  %v504_v0 = vunpack.c.l.bf16 %v566_v53  ;;  %v505_v2 = vunpack.c.h.bf16 %v566_v53 }
  0x2b   :  { %384 = vst [vmem:[%s1026_s3 + $0x120] sm:$0xff] %v320_v57  ;;  %385 = vst [vmem:[%s1026_s3 + $0x128] sm:$0xff] %v321_v58  ;;  %v508_v3 = vunpack.c.l.bf16 %v567_v54  ;;  %v509_v4 = vunpack.c.h.bf16 %v567_v54  ;;  %v189_v5 = vmul.f32 %v500_v62, %v603_v1  ;;  %v190_v6 = vmul.f32 %v501_v63, %v603_v1  ;;  %v573_v58 = vld [vmem:[%s1023_s0 + $0xe0] sm:$0xff]   ;;  %v574_v63 = vld [vmem:[%s1023_s0 + $0xe8] sm:$0xff]  }
  0x2c   :  { %386 = vst [vmem:[%s1026_s3 + $0x130] sm:$0xff] %v322_v60  ;;  %387 = vst [vmem:[%s1026_s3 + $0x138] sm:$0xff] %v323_v61  ;;  %v512_v8 = vunpack.c.l.bf16 %v568_v59  ;;  %v513_v9 = vunpack.c.h.bf16 %v568_v59  ;;  %v191_v10 = vmul.f32 %v504_v0, %v603_v1  ;;  %v192_v11 = vmul.f32 %v505_v2, %v603_v1  ;;  %v575_v0 = vld [vmem:[%s1023_s0 + $0xf0] sm:$0xff]  }
  0x2d   :  { %v193_v12 = vmul.f32 %v508_v3, %v603_v1  ;;  %v194_v13 = vmul.f32 %v509_v4, %v603_v1  ;;  %v260_v14 = vadd.f32 %v617_v7, %v189_v5  ;;  %v261_v15 = vadd.f32 %v617_v7, %v190_v6  ;;  %v576_v6 = vld [vmem:[%s1023_s0 + $0xf8] sm:$0xff]  }
  0x2e   :  { %v195_v16 = vmul.f32 %v512_v8, %v603_v1  ;;  %v196_v17 = vmul.f32 %v513_v9, %v603_v1  ;;  %v262_v18 = vadd.f32 %v617_v7, %v191_v10  ;;  %v263_v19 = vadd.f32 %v617_v7, %v192_v11 }
  0x2f   :  { %v264_v20 = vadd.f32 %v617_v7, %v193_v12  ;;  %v265_v21 = vadd.f32 %v617_v7, %v194_v13  ;;  %v324_v23 = vmax.f32 %v260_v14, 0.0  ;;  %v325_v24 = vmax.f32 %v261_v15, 0.0 }
  0x30   :  { %v266_v25 = vadd.f32 %v617_v7, %v195_v16  ;;  %v267_v26 = vadd.f32 %v617_v7, %v196_v17  ;;  %v326_v29 = vmax.f32 %v262_v18, 0.0  ;;  %v327_v30 = vmax.f32 %v263_v19, 0.0 }
  0x31   :  { %v328_v31 = vmax.f32 %v264_v20, 0.0  ;;  %v329_v32 = vmax.f32 %v265_v21, 0.0  ;;  %388 = vst [vmem:[%s1026_s3 + $0x140] sm:$0xff] %v324_v23  ;;  %389 = vst [vmem:[%s1026_s3 + $0x148] sm:$0xff] %v325_v24  ;;  %v516_v36 = vunpack.c.l.bf16 %v569_v22  ;;  %v517_v37 = vunpack.c.h.bf16 %v569_v22 }
  0x32   :  { %v330_v34 = vmax.f32 %v266_v25, 0.0  ;;  %v331_v35 = vmax.f32 %v267_v26, 0.0  ;;  %390 = vst [vmem:[%s1026_s3 + $0x150] sm:$0xff] %v326_v29  ;;  %391 = vst [vmem:[%s1026_s3 + $0x158] sm:$0xff] %v327_v30  ;;  %v520_v38 = vunpack.c.l.bf16 %v570_v27  ;;  %v521_v39 = vunpack.c.h.bf16 %v570_v27 }
  0x33   :  { %392 = vst [vmem:[%s1026_s3 + $0x160] sm:$0xff] %v328_v31  ;;  %393 = vst [vmem:[%s1026_s3 + $0x168] sm:$0xff] %v329_v32  ;;  %v524_v40 = vunpack.c.l.bf16 %v571_v28  ;;  %v525_v41 = vunpack.c.h.bf16 %v571_v28  ;;  %v197_v42 = vmul.f32 %v516_v36, %v603_v1  ;;  %v198_v43 = vmul.f32 %v517_v37, %v603_v1 }
  0x34   :  { %394 = vst [vmem:[%s1026_s3 + $0x170] sm:$0xff] %v330_v34  ;;  %395 = vst [vmem:[%s1026_s3 + $0x178] sm:$0xff] %v331_v35  ;;  %v528_v44 = vunpack.c.l.bf16 %v572_v33  ;;  %v529_v45 = vunpack.c.h.bf16 %v572_v33  ;;  %v199_v46 = vmul.f32 %v520_v38, %v603_v1  ;;  %v200_v47 = vmul.f32 %v521_v39, %v603_v1 }
  0x35   :  { %v201_v48 = vmul.f32 %v524_v40, %v603_v1  ;;  %v202_v49 = vmul.f32 %v525_v41, %v603_v1  ;;  %v268_v50 = vadd.f32 %v617_v7, %v197_v42  ;;  %v269_v51 = vadd.f32 %v617_v7, %v198_v43 }
  0x36   :  { %v203_v52 = vmul.f32 %v528_v44, %v603_v1  ;;  %v204_v53 = vmul.f32 %v529_v45, %v603_v1  ;;  %v270_v54 = vadd.f32 %v617_v7, %v199_v46  ;;  %v271_v55 = vadd.f32 %v617_v7, %v200_v47 }
  0x37   :  { %v272_v56 = vadd.f32 %v617_v7, %v201_v48  ;;  %v273_v57 = vadd.f32 %v617_v7, %v202_v49  ;;  %v332_v59 = vmax.f32 %v268_v50, 0.0  ;;  %v333_v60 = vmax.f32 %v269_v51, 0.0 }
  0x38   :  { %v274_v61 = vadd.f32 %v617_v7, %v203_v52  ;;  %v275_v62 = vadd.f32 %v617_v7, %v204_v53  ;;  %v334_v2 = vmax.f32 %v270_v54, 0.0  ;;  %v335_v3 = vmax.f32 %v271_v55, 0.0 }
  0x39   :  { %v336_v4 = vmax.f32 %v272_v56, 0.0  ;;  %v337_v5 = vmax.f32 %v273_v57, 0.0  ;;  %396 = vst [vmem:[%s1026_s3 + $0x180] sm:$0xff] %v332_v59  ;;  %397 = vst [vmem:[%s1026_s3 + $0x188] sm:$0xff] %v333_v60  ;;  %v532_v10 = vunpack.c.l.bf16 %v573_v58  ;;  %v533_v11 = vunpack.c.h.bf16 %v573_v58 }
  0x3a   :  { %v338_v8 = vmax.f32 %v274_v61, 0.0  ;;  %v339_v9 = vmax.f32 %v275_v62, 0.0  ;;  %398 = vst [vmem:[%s1026_s3 + $0x190] sm:$0xff] %v334_v2  ;;  %399 = vst [vmem:[%s1026_s3 + $0x198] sm:$0xff] %v335_v3  ;;  %v536_v12 = vunpack.c.l.bf16 %v574_v63  ;;  %v537_v13 = vunpack.c.h.bf16 %v574_v63 }
  0x3b   :  { %400 = vst [vmem:[%s1026_s3 + $0x1a0] sm:$0xff] %v336_v4  ;;  %401 = vst [vmem:[%s1026_s3 + $0x1a8] sm:$0xff] %v337_v5  ;;  %v540_v14 = vunpack.c.l.bf16 %v575_v0  ;;  %v541_v15 = vunpack.c.h.bf16 %v575_v0  ;;  %v205_v16 = vmul.f32 %v532_v10, %v603_v1  ;;  %v206_v17 = vmul.f32 %v533_v11, %v603_v1 }
  0x3c   :  { %402 = vst [vmem:[%s1026_s3 + $0x1b0] sm:$0xff] %v338_v8  ;;  %403 = vst [vmem:[%s1026_s3 + $0x1b8] sm:$0xff] %v339_v9  ;;  %v544_v18 = vunpack.c.l.bf16 %v576_v6  ;;  %v545_v19 = vunpack.c.h.bf16 %v576_v6  ;;  %v207_v20 = vmul.f32 %v536_v12, %v603_v1  ;;  %v208_v21 = vmul.f32 %v537_v13, %v603_v1 }
  0x3d   :  { %v209_v22 = vmul.f32 %v540_v14, %v603_v1  ;;  %v210_v23 = vmul.f32 %v541_v15, %v603_v1  ;;  %v276_v24 = vadd.f32 %v617_v7, %v205_v16  ;;  %v277_v25 = vadd.f32 %v617_v7, %v206_v17 }
  0x3e   :  { %v211_v26 = vmul.f32 %v544_v18, %v603_v1  ;;  %v212_v27 = vmul.f32 %v545_v19, %v603_v1  ;;  %v278_v28 = vadd.f32 %v617_v7, %v207_v20  ;;  %v279_v29 = vadd.f32 %v617_v7, %v208_v21 }
  0x3f   :  { %v280_v30 = vadd.f32 %v617_v7, %v209_v22  ;;  %v281_v31 = vadd.f32 %v617_v7, %v210_v23  ;;  %v340_v32 = vmax.f32 %v276_v24, 0.0  ;;  %v341_v33 = vmax.f32 %v277_v25, 0.0 }
  0x40   :  { %v282_v34 = vadd.f32 %v617_v7, %v211_v26  ;;  %v283_v35 = vadd.f32 %v617_v7, %v212_v27  ;;  %v342_v36 = vmax.f32 %v278_v28, 0.0  ;;  %v343_v37 = vmax.f32 %v279_v29, 0.0 }
  0x41   :  { %v344_v38 = vmax.f32 %v280_v30, 0.0  ;;  %v345_v39 = vmax.f32 %v281_v31, 0.0  ;;  %404 = vst [vmem:[%s1026_s3 + $0x1c0] sm:$0xff] %v340_v32  ;;  %405 = vst [vmem:[%s1026_s3 + $0x1c8] sm:$0xff] %v341_v33 }
  0x42   :  { %v346_v1 = vmax.f32 %v282_v34, 0.0  ;;  %v347_v40 = vmax.f32 %v283_v35, 0.0  ;;  %406 = vst [vmem:[%s1026_s3 + $0x1d0] sm:$0xff] %v342_v36  ;;  %407 = vst [vmem:[%s1026_s3 + $0x1d8] sm:$0xff] %v343_v37 }
  0x43   :  { %408 = vst [vmem:[%s1026_s3 + $0x1e0] sm:$0xff] %v344_v38  ;;  %409 = vst [vmem:[%s1026_s3 + $0x1e8] sm:$0xff] %v345_v39 }
  0x44   :  { %410 = vst [vmem:[%s1026_s3 + $0x1f0] sm:$0xff] %v346_v1  ;;  %411 = vst [vmem:[%s1026_s3 + $0x1f8] sm:$0xff] %v347_v40 }

// kernel: conv_bn_relu_2d.2
= control target key start
LH: loop header
LB: loop body
LE: loop exit
PB: predicated region body
PF: predicated region fallthrough
CT: control target
= control target key end

     0   :  { %s2734_s12 = smov 0   ;;  %s2736_s13 = smov 0   ;;  %s3512_s0 = inlined_call_operand.vmem [shape: bf16[2,18,18,4], index: 0, kind: input, shape index: {}]   ;;  %s3513_s1 = inlined_call_operand.vmem [shape: bf16[36,128], index: 1, kind: input, shape index: {}]   ;;  %s3514_s2 = inlined_call_operand.vmem [shape: bf16[2,256,128], index: 2, kind: output, shape index: {0}]   ;;  %s3515_s3 = inlined_call_operand.vmem [shape: f32[2,2,2,128], index: 3, kind: output, shape index: {1}]  }
   0x1   :  { %s2738_s14 = smov 0   ;;  %s2740_s15 = smov 0  }
   0x2   :  { %s2742_s16 = smov 0  }
   0x3 LB: > { %s23_s17 = sadd.s32 1, %s2696_s14  ;;  %s26_s18 = sadd.s32 1, %s2700_s15  ;;  %s2704_s16 = sphi %s2742_s16, %s14_s16   ;;  %s2700_s15 = sphi %s2740_s15, %s3523_s15   ;;  %s2696_s14 = sphi %s2738_s14, %s3522_s14   ;;  %s2692_s13 = sphi %s2736_s13, %s3521_s13   ;;  %s2688_s12 = sphi %s2734_s12, %s3520_s12  }
   0x4   : > { %p24_p0 = scmp.ge.s32.totalorder %s23_s17, 2  ;;  %p2298_p1 = scmp.ge.s32.totalorder %s2704_s16, 1 }
   0x5   : > { %p156_p2 = scmp.lt.s32.totalorder %s2704_s16, 5 }
   0x6   : > { %s3525_s17 = smov (%p24_p0, %s23_s17), 0  ;;  %s3527_s18 = smov (!%p24_p0, %s26_s18), %s2700_s15 }
   0x7   : > { %p157_p3 = pnand %p2298_p1, %p156_p2  ;;  %p28_p4 = scmp.ge.s32.totalorder %s3527_s18, 2 }
   0x8   : > { %p192_p5 = scmp.lt.s32.totalorder (!%p157_p3), %s2692_s13, 1  ;;  %s2501_s19 = smul.u32 (!%p157_p3), 96, %s2688_s12 }
   0x9   : > { %s3529_s18 = smov (%p28_p4, %s3527_s18), 0  ;;  %160 = sbr.rel (%p157_p3) target bundleno = 618 (0x26a), region = 28 }
   0xa   : > { %s2706_s25 = smov (!%p157_p3), 12   ;;  %s2707_s26 = smov (!%p157_p3), 8  }
   0xb   : > { %s2708_s27 = smov (!%p157_p3), 4   ;;  %s2709_s28 = smov (!%p157_p3), 16  }
   0xc   : > { %s2710_s29 = smov (!%p157_p3), 20   ;;  %s2711_s30 = smov (!%p157_p3), 24  }
   0xd   : > { %s2712_s4 = smov (!%p157_p3), 28   ;;  %s2713_s5 = smov (!%p157_p3), 32  }
   0xe   : > { %s3531_s13 = smov (!%p192_p5, %s2692_s13), 1  ;;  %vm585_vm0 = vcmask 1042432   ;;  %vm586_vm1 = vcmask 1046532   ;;  %vm277_vm2 = vsmask.f32 3328  ;;  %vm236_vm6 = vcmask 27648  }
   0xf   : > { %s2606_s20 = smul.u32 216, %s3531_s13  ;;  %vm278_vm3 = vsmask.f32 7440  ;;  %vm2781_vm4 = vmor %vm585_vm0, %vm586_vm1  ;;  %vm1912_vm7 = vcmask 1041408   ;;  %vm520_vm8 = vcmask 60448   ;;  %vm692_vm9 = vcmask 93248  }
  0x10   : > { %vm2808_vm5 = vmor %vm277_vm2, %vm278_vm3  ;;  %vm793_vm10 = vcmask 126048   ;;  %vm1074_vm11 = vcmask 158848   ;;  %vm1243_vm12 = vcmask 191648   ;;  %vm1344_vm13 = vcmask 224448   ;;  %p209_p7 = scmp.lt.s32.totalorder %s2688_s12, 1 }
  0x11   : > { %s196_s23 = scalar_lea.vmem %s3512_s0, %s2606_s20  ;;  %vm1625_vm14 = vcmask 257248   ;;  %vm1794_vm15 = vcmask 290048   ;;  %vm1887_vm0 = vcmask 293888   ;;  %s2301_s20 = sshll.u32 %s3531_s13, 5 }
  0x12   : > { %s2773_s24 = scalar_lea.vmem %s196_s23, %s2501_s19  ;;  %s2300_s19 = sshll.u32 %s2688_s12, 4 }
  0x13   : > { %v2318_v0 = vld [vmem:[%s2773_s24 + $0xc] sm:$0xf]  ;;  %v2319_v1 = vld [vmem:[%s2773_s24 + $0x10] sm:$0xf]  ;;  %v537_v2 = vld [vmem:[%s2773_s24] sm:$0xe] }
  0x14   : > { %745 = vrot.lane.b32.xlu0 %v2318_v0, %s2706_s25  ;;  %747 = vrot.lane.b32.xlu1 %v2319_v1, %s2706_s25  ;;  %v538_v3 = vld [vmem:[%s2773_s24 + $0x4] sm:$0xf]  ;;  %v2308_v5 = vrot.slane %v537_v2, 9  ;;  %v539_v6 = vld [vmem:[%s2773_s24 + $0x8] sm:$0x1]  ;;  %p200_p6 = scmp.lt.s32.totalorder %s2300_s19, 31 }
  0x15   : > { %v590_v7 = vrot.slane %v538_v3, 5  ;;  %v593_v8 = vrot.slane %v539_v6, 5  ;;  %v540_v9 = vld [vmem:[%s2773_s24 + $0xc] sm:$0xe]  ;;  %v541_v10 = vld [vmem:[%s2773_s24 + $0x10] sm:$0xf] }
  0x16   : > { %v2309_v11 = vrot.slane %v540_v9, 9  ;;  %v597_v12 = vrot.slane %v541_v10, 5  ;;  %v542_v13 = vld [vmem:[%s2773_s24 + $0x14] sm:$0x1]  ;;  %v253_v14 = vld [vmem:[%s2773_s24] sm:$0xf] }
  0x17   : > { %v591_v15 = vsel %vm2781_vm4, %v2308_v5, %v590_v7  ;;  %v592_v16 = vrot.slane %v590_v7, 4  ;;  %v600_v17 = vrot.slane %v542_v13, 5  ;;  %v254_v18 = vld [vmem:[%s2773_s24 + $0x4] sm:$0xf]  ;;  %v281_v19 = vshrl.u32 %v253_v14, 16  ;;  %s3533_s19 = smov (!%p200_p6, %s2300_s19), 31 }
  0x18   : > { %644 = vrot.lane.b32.xlu0 %v591_v15, %s2707_s26  ;;  %v598_v20 = vsel %vm2781_vm4, %v2309_v11, %v597_v12  ;;  %v599_v21 = vrot.slane %v597_v12, 4  ;;  %v284_v22 = vshll.u32 %v253_v14, 16  ;;  %v290_v23 = vshll.u32 %v254_v18, 16  ;;  %v256_v24 = vld [vmem:[%s2773_s24 + $0xc] sm:$0xf]  ;;  %s203_s21 = sadd.s32 %s2301_s20, %s3533_s19  ;;  %s3535_s12 = smov (!%p209_p7, %s2688_s12), 1 }
  0x19   : > { %v594_v25 = vsel %vm2781_vm4, %v592_v16, %v593_v8  ;;  %v283_v26 = vrot.slane %v281_v19, 4  ;;  %v294_v27 = vshrl.u32 %v254_v18, 16  ;;  %v257_v28 = vld [vmem:[%s2773_s24 + $0x10] sm:$0xf]  ;;  %v305_v29 = vshrl.u32 %v256_v24, 16  ;;  %s2302_s22 = sshll.u32 %s203_s21, 2 }
  0x1a   : > { %646 = vrot.lane.b32.xlu1 %v594_v25, %s2707_s26  ;;  %v601_v30 = vsel %vm2781_vm4, %v599_v21, %v600_v17  ;;  %v286_v31 = vrot.slane %v284_v22, 5  ;;  %v292_v32 = vrot.slane %v290_v23, 5  ;;  %v308_v33 = vshll.u32 %v256_v24, 16  ;;  %v255_v34 = vld [vmem:[%s2773_s24 + $0x8] sm:$0x1] }
  0x1b   : > { %v307_v35 = vrot.slane %v305_v29, 4  ;;  %v314_v36 = vshll.u32 %v257_v28, 16  ;;  %v318_v37 = vshrl.u32 %v257_v28, 16  ;;  %v296_v38 = vrot.slane %v294_v27, 4  ;;  %v258_v39 = vld [vmem:[%s2773_s24 + $0x14] sm:$0x1] }
  0x1c   : > { %648 = vrot.lane.b32.xlu0 %v598_v20, %s2707_s26  ;;  %v287_v40 = vor.u32 %v286_v31, %v283_v26  ;;  %v310_v41 = vrot.slane %v308_v33, 5  ;;  %v300_v42 = vshll.u32 %v255_v34, 16  ;;  %v324_v43 = vshll.u32 %v258_v39, 16  ;;  %v2335_v48 = vld [vmem:[%s2773_s24 + $0x10] sm:$0xf] }
  0x1d   : > { %v316_v45 = vrot.slane %v314_v36, 5  ;;  %v297_v46 = vor.u32 %v296_v38, %v292_v32  ;;  %v320_v47 = vrot.slane %v318_v37, 4  ;;  %v844_v55 = vshll.u32 %v2335_v48, 16  ;;  %v2334_v57 = vld [vmem:[%s2773_s24 + $0xc] sm:$0xf] }
  0x1e   : > { %650 = vrot.lane.b32.xlu1 %v601_v30, %s2707_s26  ;;  %v288_v49 = vrot.slane %v287_v40, 4  ;;  %v311_v50 = vor.u32 %v310_v41, %v307_v35  ;;  %v302_v51 = vrot.slane %v300_v42, 5  ;;  %v326_v52 = vrot.slane %v324_v43, 5  ;;  %v2336_v60 = vld [vmem:[%s2773_s24 + $0x14] sm:$0x1] }
  0x1f   : > { %v298_v53 = vrot.slane %v297_v46, 4  ;;  %v321_v54 = vor.u32 %v320_v47, %v316_v45  ;;  %v848_v56 = vshrl.u32 %v2335_v48, 16  ;;  %v835_v61 = vshrl.u32 %v2334_v57, 16  ;;  %v2338_v62 = vld [vmem:[%s2773_s24 + $0x1c] sm:$0xf] }
  0x20   : > { %v293_v58 = vsel %vm2808_vm5, %v288_v49, %v292_v32  ;;  %v312_v59 = vrot.slane %v311_v50, 4  ;;  %v846_v0 = vrot.slane %v844_v55, 5  ;;  %v838_v6 = vshll.u32 %v2334_v57, 16  ;;  %v2337_v7 = vld [vmem:[%s2773_s24 + $0x18] sm:$0xf] }
  0x21   : > { %472 = vrot.lane.b32.xlu0 %v293_v58, %s2708_s27  ;;  %v322_v63 = vrot.slane %v321_v54, 4  ;;  %v850_v1 = vrot.slane %v848_v56, 4  ;;  %v303_v3 = vsel %vm2808_vm5, %v298_v53, %v302_v51  ;;  %v837_v5 = vrot.slane %v835_v61, 4  ;;  %v2339_v14 = vld [vmem:[%s2773_s24 + $0x20] sm:$0x1] }
  0x22   : > { %v317_v2 = vsel %vm2808_vm5, %v312_v59, %v316_v45  ;;  %v854_v9 = vshll.u32 %v2336_v60, 16  ;;  %v868_v10 = vshll.u32 %v2338_v62, 16  ;;  %v872_v11 = vshrl.u32 %v2338_v62, 16  ;;  %v2320_v19 = vld [vmem:[%s2773_s24 + $0x18] sm:$0xf] }
  0x23   : > { %476 = vrot.lane.b32.xlu1 %v317_v2, %s2708_s27  ;;  %v327_v8 = vsel %vm2808_vm5, %v322_v63, %v326_v52  ;;  %v851_v12 = vor.u32 %v850_v1, %v846_v0  ;;  %v840_v13 = vrot.slane %v838_v6, 5  ;;  %v859_v15 = vshrl.u32 %v2337_v7, 16  ;;  %v2321_v25 = vld [vmem:[%s2773_s24 + $0x1c] sm:$0xf]  ;;  %v2359_v30 = vld [vmem:[%s2773_s24 + $0x10] sm:$0xf] }
  0x24   : > { %v862_v16 = vshll.u32 %v2337_v7, 16  ;;  %v870_v17 = vrot.slane %v868_v10, 5  ;;  %v874_v18 = vrot.slane %v872_v11, 4  ;;  %v856_v23 = vrot.slane %v854_v9, 5  ;;  %v2358_v33 = vld [vmem:[%s2773_s24 + $0xc] sm:$0xe] }
  0x25   : > { %474 = vrot.lane.b32.xlu0 %v303_v3, %s2708_s27  ;;  %v841_v20 = vor.u32 %v840_v13, %v837_v5  ;;  %v861_v21 = vrot.slane %v859_v15, 4  ;;  %v878_v24 = vshll.u32 %v2339_v14, 16  ;;  %v852_v26 = vrot.slane %v851_v12, 4  ;;  %v2362_v38 = vld [vmem:[%s2773_s24 + $0x1c] sm:$0xf] }
  0x26   : > { %v864_v22 = vrot.slane %v862_v16, 5  ;;  %v875_v28 = vor.u32 %v874_v18, %v870_v17  ;;  %v1141_v37 = vrot.slane %v2359_v30, 5  ;;  %v2360_v39 = vld [vmem:[%s2773_s24 + $0x14] sm:$0x1]  ;;  %v2382_v41 = vrot.slane %v2358_v33, 9 }
  0x27   : > { %478 = vrot.lane.b32.xlu1 %v327_v8, %s2708_s27  ;;  %v842_v27 = vrot.slane %v841_v20, 4  ;;  %v857_v34 = vsel %vm2808_vm5, %v852_v26, %v856_v23  ;;  %v880_v36 = vrot.slane %v878_v24, 5  ;;  %v2361_v42 = vld [vmem:[%s2773_s24 + $0x18] sm:$0xe]  ;;  %v1148_v43 = vrot.slane %v2362_v38, 5 }
  0x28   : > { %v865_v29 = vor.u32 %v864_v22, %v861_v21  ;;  %v876_v35 = vrot.slane %v875_v28, 4  ;;  %v2408_v45 = vld [vmem:[%s2773_s24 + $0x18] sm:$0xf]  ;;  %v1143_v47 = vrot.slane %v1141_v37, 4  ;;  %v1144_v48 = vrot.slane %v2360_v39, 5 }
  0x29   : > { %749 = vrot.lane.b32.xlu0 %v2320_v19, %s2706_s25  ;;  %v847_v31 = vsel %vm2808_vm5, %v842_v27, %v846_v0  ;;  %v2363_v49 = vld [vmem:[%s2773_s24 + $0x20] sm:$0x1]  ;;  %v2383_v50 = vrot.slane %v2361_v42, 9  ;;  %v2409_v51 = vld [vmem:[%s2773_s24 + $0x1c] sm:$0xf]  ;;  %v1142_v52 = vsel %vm2781_vm4, %v2382_v41, %v1141_v37  ;;  %v1386_v53 = vshrl.u32 %v2408_v45, 16 }
  0x2a   : > { %v866_v32 = vrot.slane %v865_v29, 4  ;;  %v881_v46 = vsel %vm2808_vm5, %v876_v35, %v880_v36  ;;  %v1389_v54 = vshll.u32 %v2408_v45, 16  ;;  %v1150_v55 = vrot.slane %v1148_v43, 4  ;;  %v2411_v57 = vld [vmem:[%s2773_s24 + $0x24] sm:$0xf] }
  0x2b   : > { %751 = vrot.lane.b32.xlu1 %v2321_v25, %s2706_s25  ;;  %v1151_v56 = vrot.slane %v2363_v49, 5  ;;  %v1145_v58 = vsel %vm2781_vm4, %v1143_v47, %v1144_v48  ;;  %v1395_v59 = vshll.u32 %v2409_v51, 16  ;;  %v1399_v60 = vshrl.u32 %v2409_v51, 16  ;;  %v2412_v62 = vld [vmem:[%s2773_s24 + $0x28] sm:$0xf] }
  0x2c   : > { %v871_v40 = vsel %vm2808_vm5, %v866_v32, %v870_v17  ;;  %v1149_v61 = vsel %vm2781_vm4, %v2383_v50, %v1148_v43  ;;  %v1388_v63 = vrot.slane %v1386_v53, 4  ;;  %v1391_v0 = vrot.slane %v1389_v54, 5  ;;  %v2410_v5 = vld [vmem:[%s2773_s24 + $0x20] sm:$0x1]  ;;  %v2392_v10 = vld [vmem:[%s2773_s24 + $0x18] sm:$0xf] }
  0x2d   : > { %1026 = vrot.lane.b32.xlu0 %v847_v31, %s2709_s28  ;;  %v1410_v1 = vshrl.u32 %v2411_v57, 16  ;;  %v1413_v2 = vshll.u32 %v2411_v57, 16  ;;  %v1152_v3 = vsel %vm2781_vm4, %v1150_v55, %v1151_v56  ;;  %v1397_v6 = vrot.slane %v1395_v59, 5  ;;  %v259_v15 = vld [vmem:[%s2773_s24 + $0x18] sm:$0xf] }
  0x2e   : > { %v1401_v7 = vrot.slane %v1399_v60, 4  ;;  %v1419_v8 = vshll.u32 %v2412_v62, 16  ;;  %v1423_v9 = vshrl.u32 %v2412_v62, 16  ;;  %v1392_v11 = vor.u32 %v1391_v0, %v1388_v63  ;;  %v2393_v16 = vld [vmem:[%s2773_s24 + $0x1c] sm:$0xf] }
  0x2f   : > { %1028 = vrot.lane.b32.xlu1 %v857_v34, %s2709_s28  ;;  %v1412_v12 = vrot.slane %v1410_v1, 4  ;;  %v1415_v13 = vrot.slane %v1413_v2, 5  ;;  %v1405_v14 = vshll.u32 %v2410_v5, 16  ;;  %v2413_v18 = vld [vmem:[%s2773_s24 + $0x2c] sm:$0x1]  ;;  %v329_v25 = vshrl.u32 %v259_v15, 16 }
  0x30   : > { %v1402_v17 = vor.u32 %v1401_v7, %v1397_v6  ;;  %v1421_v19 = vrot.slane %v1419_v8, 5  ;;  %v1425_v20 = vrot.slane %v1423_v9, 4  ;;  %v260_v21 = vld [vmem:[%s2773_s24 + $0x1c] sm:$0xf]  ;;  %v2394_v22 = vld [vmem:[%s2773_s24 + $0x24] sm:$0xf] }
  0x31   : > { %1030 = vrot.lane.b32.xlu0 %v871_v40, %s2709_s28  ;;  %v1393_v23 = vrot.slane %v1392_v11, 4  ;;  %v1416_v24 = vor.u32 %v1415_v13, %v1412_v12  ;;  %v332_v26 = vshll.u32 %v259_v15, 16  ;;  %v2395_v27 = vld [vmem:[%s2773_s24 + $0x28] sm:$0xf]  ;;  %v1407_v28 = vrot.slane %v1405_v14, 5 }
  0x32   : > { %v1429_v29 = vshll.u32 %v2413_v18, 16  ;;  %v1403_v30 = vrot.slane %v1402_v17, 4  ;;  %v1426_v31 = vor.u32 %v1425_v20, %v1421_v19  ;;  %v2433_v32 = vld [vmem:[%s2773_s24 + $0x1c] sm:$0xf]  ;;  %v338_v33 = vshll.u32 %v260_v21, 16 }
  0x33   : > { %1032 = vrot.lane.b32.xlu1 %v881_v46, %s2709_s28  ;;  %v342_v34 = vshrl.u32 %v260_v21, 16  ;;  %v1398_v35 = vsel %vm2808_vm5, %v1393_v23, %v1397_v6  ;;  %v1417_v36 = vrot.slane %v1416_v24, 4  ;;  %v2432_v37 = vld [vmem:[%s2773_s24 + $0x18] sm:$0xe]  ;;  %v331_v38 = vrot.slane %v329_v25, 4 }
  0x34   : > { %v334_v39 = vrot.slane %v332_v26, 5  ;;  %v1431_v40 = vrot.slane %v1429_v29, 5  ;;  %v2434_v41 = vld [vmem:[%s2773_s24 + $0x20] sm:$0x1]  ;;  %v1692_v42 = vrot.slane %v2433_v32, 5  ;;  %v1408_v45 = vsel %vm2808_vm5, %v1403_v30, %v1407_v28 }
  0x35   : > { %1195 = vrot.lane.b32.xlu0 %v1142_v52, %s2710_s29  ;;  %v262_v43 = vld [vmem:[%s2773_s24 + $0x24] sm:$0xf]  ;;  %v1427_v46 = vrot.slane %v1426_v31, 4  ;;  %v261_v47 = vld [vmem:[%s2773_s24 + $0x20] sm:$0x1]  ;;  %v340_v48 = vrot.slane %v338_v33, 5  ;;  %v1422_v52 = vsel %vm2808_vm5, %v1417_v36, %v1421_v19 }
  0x36   : > { %v344_v49 = vrot.slane %v342_v34, 4  ;;  %v2456_v50 = vrot.slane %v2432_v37, 9  ;;  %v263_v51 = vld [vmem:[%s2773_s24 + $0x28] sm:$0xf]  ;;  %v335_v53 = vor.u32 %v334_v39, %v331_v38  ;;  %v353_v54 = vshrl.u32 %v262_v43, 16 }
  0x37   : > { %1197 = vrot.lane.b32.xlu1 %v1145_v58, %s2710_s29  ;;  %v356_v55 = vshll.u32 %v262_v43, 16  ;;  %v1694_v56 = vrot.slane %v1692_v42, 4  ;;  %v1695_v57 = vrot.slane %v2434_v41, 5  ;;  %v348_v58 = vshll.u32 %v261_v47, 16  ;;  %v2436_v63 = vld [vmem:[%s2773_s24 + $0x28] sm:$0xf] }
  0x38   : > { %v1432_v59 = vsel %vm2808_vm5, %v1427_v46, %v1431_v40  ;;  %v345_v60 = vor.u32 %v344_v49, %v340_v48  ;;  %v366_v62 = vshrl.u32 %v263_v51, 16  ;;  %v1693_v0 = vsel %vm2781_vm4, %v2456_v50, %v1692_v42  ;;  %v2435_v7 = vld [vmem:[%s2773_s24 + $0x24] sm:$0xe]  ;;  %v2437_v9 = vld [vmem:[%s2773_s24 + $0x2c] sm:$0x1] }
  0x39   : > { %1199 = vrot.lane.b32.xlu0 %v1149_v61, %s2710_s29  ;;  %v362_v61 = vshll.u32 %v263_v51, 16  ;;  %v336_v1 = vrot.slane %v335_v53, 4  ;;  %v355_v2 = vrot.slane %v353_v54, 4  ;;  %v1696_v5 = vsel %vm2781_vm4, %v1694_v56, %v1695_v57  ;;  %v264_v13 = vld [vmem:[%s2773_s24 + $0x2c] sm:$0x1] }
  0x3a   : > { %v350_v6 = vrot.slane %v348_v58, 5  ;;  %v346_v8 = vrot.slane %v345_v60, 4  ;;  %v368_v12 = vrot.slane %v366_v62, 4  ;;  %v2457_v15 = vrot.slane %v2435_v7, 9  ;;  %v543_v25 = vld [vmem:[%s2773_s24 + $0x18] sm:$0xe] }
  0x3b   : > { %1201 = vrot.lane.b32.xlu1 %v1152_v3, %s2710_s29  ;;  %v358_v3 = vrot.slane %v356_v55, 5  ;;  %v364_v11 = vrot.slane %v362_v61, 5  ;;  %v341_v14 = vsel %vm2808_vm5, %v336_v1, %v340_v48  ;;  %v1702_v17 = vrot.slane %v2437_v9, 5  ;;  %v547_v30 = vld [vmem:[%s2773_s24 + $0x28] sm:$0xf] }
  0x3c   : > { %v351_v18 = vsel %vm2808_vm5, %v346_v8, %v350_v6  ;;  %v372_v21 = vshll.u32 %v264_v13, 16  ;;  %v545_v31 = vld [vmem:[%s2773_s24 + $0x20] sm:$0x1]  ;;  %v546_v32 = vld [vmem:[%s2773_s24 + $0x24] sm:$0xe]  ;;  %v2310_v34 = vrot.slane %v543_v25, 9 }
  0x3d   : > { %1296 = vrot.lane.b32.xlu0 %v2392_v10, %s2711_s30  ;;  %v1699_v10 = vrot.slane %v2436_v63, 5  ;;  %v369_v20 = vor.u32 %v368_v12, %v364_v11  ;;  %v222_v36 = vld [vmem:[%s2773_s24 + $0xc] sm:$0xf]  ;;  %v611_v37 = vrot.slane %v547_v30, 5  ;;  %v2340_v38 = vld [vmem:[%s2773_s24 + $0x24] sm:$0xf] }
  0x3e   : > { %v374_v28 = vrot.slane %v372_v21, 5  ;;  %239 = vst.msk [vmem:[#allocation2 + $0x8] sm:$0xf] %vm236_vm6, %v222_v36  ;;  %v607_v41 = vrot.slane %v545_v31, 5  ;;  %v548_v42 = vld [vmem:[%s2773_s24 + $0x2c] sm:$0x1] }
  0x3f   : > { %1298 = vrot.lane.b32.xlu1 %v2393_v16, %s2711_s30  ;;  %v359_v16 = vor.u32 %v358_v3, %v355_v2  ;;  %v1701_v19 = vrot.slane %v1699_v10, 4  ;;  %v1700_v23 = vsel %vm2781_vm4, %v2457_v15, %v1699_v10  ;;  %v2311_v43 = vrot.slane %v546_v32, 9  ;;  %v221_v49 = vld [vmem:[%s2773_s24 + $0x4] sm:$0xf]  ;;  %v223_v53 = vld [vmem:[%s2773_s24 + $0x10] sm:$0xf] }
  0x40   : > { %v883_v47 = vshrl.u32 %v2340_v38, 16  ;;  %v886_v48 = vshll.u32 %v2340_v38, 16  ;;  %v613_v50 = vrot.slane %v611_v37, 4  ;;  %v614_v51 = vrot.slane %v548_v42, 5  ;;  %238 = vst.msk [vmem:[#allocation2 + $0x4] sm:$0xf] %vm236_vm6, %v221_v49 }
  0x41   : > { %1300 = vrot.lane.b32.xlu0 %v2394_v22, %s2711_s30  ;;  %v544_v22 = vld [vmem:[%s2773_s24 + $0x1c] sm:$0xf]  ;;  %v360_v24 = vrot.slane %v359_v16, 4  ;;  %v1703_v26 = vsel %vm2781_vm4, %v1701_v19, %v1702_v17  ;;  %240 = vst.msk [vmem:[#allocation2 + $0xc] sm:$0xf] %vm236_vm6, %v223_v53  ;;  %v612_v57 = vsel %vm2781_vm4, %v2311_v43, %v611_v37  ;;  %v2656_v53 = vld [vmem:[%s3513_s1 + $0x8] sm:$0xff]  }
  0x42   : > { %v604_v29 = vrot.slane %v544_v22, 5  ;;  %v2344_v58 = vld [vmem:[%s2773_s24 + $0x34] sm:$0xf]  ;;  %v888_v60 = vrot.slane %v886_v48, 5  ;;  %v615_v63 = vsel %vm2781_vm4, %v613_v50, %v614_v51  ;;  %v2322_v6 = vld [vmem:[%s2773_s24 + $0x24] sm:$0xf] }
  0x43   : > { %1302 = vrot.lane.b32.xlu1 %v2395_v27, %s2711_s30  ;;  %v370_v27 = vrot.slane %v369_v20, 4  ;;  %v365_v33 = vsel %vm2808_vm5, %v360_v24, %v364_v11  ;;  %v916_v2 = vshll.u32 %v2344_v58, 16  ;;  %v920_v3 = vshrl.u32 %v2344_v58, 16  ;;  %v2323_v10 = vld [vmem:[%s2773_s24 + $0x28] sm:$0xf] }
  0x44   : > { %v606_v40 = vrot.slane %v604_v29, 4  ;;  %v605_v46 = vsel %vm2781_vm4, %v2310_v34, %v604_v29  ;;  %v2345_v15 = vld [vmem:[%s2773_s24 + $0x38] sm:$0x1]  ;;  %v2324_v16 = vld [vmem:[%s2773_s24 + $0x30] sm:$0xf] }
  0x45   : > { %1577 = vrot.lane.b32.xlu0 %v1398_v35, %s2712_s4  ;;  %v220_v35 = vld [vmem:[%s2773_s24] sm:$0xf]  ;;  %v375_v39 = vsel %vm2808_vm5, %v370_v27, %v374_v28  ;;  %v918_v13 = vrot.slane %v916_v2, 5  ;;  %v2325_v19 = vld [vmem:[%s2773_s24 + $0x34] sm:$0xf] }
  0x46   : > { %237 = vst.msk [vmem:[#allocation2] sm:$0xf] %vm236_vm6, %v220_v35  ;;  %v608_v54 = vsel %vm2781_vm4, %v606_v40, %v607_v41  ;;  %v2365_v24 = vld [vmem:[%s2773_s24 + $0x28] sm:$0xf]  ;;  %v2364_v27 = vld [vmem:[%s2773_s24 + $0x24] sm:$0xe] }
  0x47   : > { %1579 = vrot.lane.b32.xlu1 %v1408_v45, %s2712_s4  ;;  %v2341_v45 = vld [vmem:[%s2773_s24 + $0x28] sm:$0xf]  ;;  %v2368_v28 = vld [vmem:[%s2773_s24 + $0x34] sm:$0xf]  ;;  %v1155_v32 = vrot.slane %v2365_v24, 5  ;;  %v2384_v35 = vrot.slane %v2364_v27, 9 }
  0x48   : > { %v892_v55 = vshll.u32 %v2341_v45, 16  ;;  %v896_v56 = vshrl.u32 %v2341_v45, 16  ;;  %v2369_v36 = vld [vmem:[%s2773_s24 + $0x38] sm:$0x1]  ;;  %v1162_v37 = vrot.slane %v2368_v28, 5 }
  0x49   : > { %1581 = vrot.lane.b32.xlu0 %v1422_v52, %s2712_s4  ;;  %v2343_v52 = vld [vmem:[%s2773_s24 + $0x30] sm:$0xf]  ;;  %v1157_v41 = vrot.slane %v1155_v32, 4  ;;  %v225_v43 = vld [vmem:[%s2773_s24 + $0x1c] sm:$0xf]  ;;  %v1165_v45 = vrot.slane %v2369_v36, 5  ;;  %v1156_v49 = vsel %vm2781_vm4, %v2384_v35, %v1155_v32 }
  0x4a   : > { %v907_v61 = vshrl.u32 %v2343_v52, 16  ;;  %v910_v62 = vshll.u32 %v2343_v52, 16  ;;  %v898_v1 = vrot.slane %v896_v56, 4  ;;  %v2367_v38 = vld [vmem:[%s2773_s24 + $0x30] sm:$0xe]  ;;  %v1164_v50 = vrot.slane %v1162_v37, 4 }
  0x4b   : > { %1583 = vrot.lane.b32.xlu1 %v1432_v59, %s2712_s4  ;;  %v885_v59 = vrot.slane %v883_v47, 4  ;;  %v2415_v47 = vld [vmem:[%s2773_s24 + $0x34] sm:$0xf]  ;;  %242 = vst.msk [vmem:[#allocation2 + $0x14] sm:$0xf] %vm236_vm6, %v225_v43 }
  0x4c   : > { %v909_v8 = vrot.slane %v907_v61, 4  ;;  %v912_v9 = vrot.slane %v910_v62, 5  ;;  %v224_v48 = vld [vmem:[%s2773_s24 + $0x18] sm:$0xf]  ;;  %v1447_v58 = vshrl.u32 %v2415_v47, 16 }
  0x4d   : > { %1746 = vrot.lane.b32.xlu0 %v1693_v0, %s2713_s5  ;;  %v894_v0 = vrot.slane %v892_v55, 5  ;;  %v889_v7 = vor.u32 %v888_v60, %v885_v59  ;;  %241 = vst.msk [vmem:[#allocation2 + $0x10] sm:$0xf] %vm236_vm6, %v224_v48  ;;  %v2655_v55 = vld [vmem:[%s3513_s1 + $0x10] ss:$0 sps:$4 sm:$0x33]  }
  0x4e   : > { %v2418_v60 = vld [vmem:[%s2773_s24 + $0x40] sm:$0xf]  ;;  %2604 = vmatprep.subr.msk.bf16.mxu0 %vm1912_vm7, %v2655_v55  ;;  %v1914_v61 = vsel %vm1912_vm7, %v2655_v55, 0  ;;  %v227_v2 = vld [vmem:[%s2773_s24 + $0x28] sm:$0xf]  ;;  %2605 = vmatprep.subr.msk.bf16.mxu1 %vm1912_vm7, %v2655_v55 }
  0x4f   : > { %1748 = vrot.lane.b32.xlu1 %v1696_v5, %s2713_s5  ;;  %v2342_v5 = vld [vmem:[%s2773_s24 + $0x2c] sm:$0x1]  ;;  %v899_v11 = vor.u32 %v898_v1, %v894_v0  ;;  %v890_v17 = vrot.slane %v889_v7, 4  ;;  %2577 = vmatpush3.bf16.msra.mxu0 %v1914_v61  ;;  %244 = vst.msk [vmem:[#allocation2 + $0x1c] sm:$0xf] %vm236_vm6, %v227_v2 }
  0x50   : > { %v902_v12 = vshll.u32 %v2342_v5, 16  ;;  %2578 = vmatprep.subr.bf16.mxu0 %v2656_v53  ;;  %v226_v5 = vld [vmem:[%s2773_s24 + $0x24] sm:$0xf]  ;;  %v2416_v7 = vld [vmem:[%s2773_s24 + $0x38] sm:$0x1]  ;;  %2601 = vmatpush3.bf16.msra.mxu1 %v1914_v61 }
  0x51   : > { %480 = vrot.lane.b32.xlu0 %v341_v14, %s2708_s27  ;;  %v922_v14 = vrot.slane %v920_v3, 4  ;;  %v900_v20 = vrot.slane %v899_v11, 4  ;;  %v895_v25 = vsel %vm2808_vm5, %v890_v17, %v894_v0  ;;  %v1166_v3 = vsel %vm2781_vm4, %v1164_v50, %v1165_v45  ;;  %243 = vst.msk [vmem:[#allocation2 + $0x18] sm:$0xf] %vm236_vm6, %v226_v5  ;;  %2599 = vmatprep.subr.bf16.mxu1 %v2656_v53  ;;  %v265_v17 = vld [vmem:[%s2773_s24 + $0x30] sm:$0xf] }
  0x52   : > { %v904_v21 = vrot.slane %v902_v12, 5  ;;  %v1471_v11 = vshrl.u32 %v2418_v60, 16  ;;  %v2396_v12 = vld [vmem:[%s2773_s24 + $0x30] sm:$0xf]  ;;  %v2398_v24 = vld [vmem:[%s2773_s24 + $0x3c] sm:$0xf] }
  0x53   : > { %482 = vrot.lane.b32.xlu1 %v351_v18, %s2708_s27  ;;  %v913_v18 = vor.u32 %v912_v9, %v909_v8  ;;  %v923_v22 = vor.u32 %v922_v14, %v918_v13  ;;  %v1449_v9 = vrot.slane %v1447_v58, 4  ;;  %2579 = vmatpush3.bf16.msra.mxu0 %v2656_v53  ;;  %v377_v27 = vshrl.u32 %v265_v17, 16  ;;  %v2440_v43 = vld [vmem:[%s2773_s24 + $0x38] sm:$0x1] }
  0x54   : > { %v905_v29 = vsel %vm2808_vm5, %v900_v20, %v904_v21  ;;  %v2419_v20 = vld [vmem:[%s2773_s24 + $0x44] sm:$0x1]  ;;  %2602 = vmatpush3.bf16.msra.mxu1 %v2656_v53  ;;  %v380_v28 = vshll.u32 %v265_v17, 16  ;;  %v269_v53 = vld [vmem:[%s2773_s24 + $0x40] sm:$0xf]  ;;  %v1709_v61 = vrot.slane %v2440_v43, 5 }
  0x55   : > { %1750 = vrot.lane.b32.xlu0 %v1700_v23, %s2713_s5  ;;  %v926_v23 = vshll.u32 %v2345_v15, 16  ;;  %v924_v30 = vrot.slane %v923_v22, 4  ;;  %v1473_v22 = vrot.slane %v1471_v11, 4  ;;  %v414_v2 = vshrl.u32 %v269_v53, 16  ;;  %v228_v43 = vld [vmem:[%s2773_s24 + $0x30] sm:$0xf] }
  0x56   : > { %245 = vst.msk [vmem:[#allocation2 + $0x20] sm:$0xf] %vm236_vm6, %v228_v43 }
  0x57   : > { %1752 = vrot.lane.b32.xlu1 %v1703_v26, %s2713_s5  ;;  %v914_v26 = vrot.slane %v913_v18, 4  ;;  %v928_v31 = vrot.slane %v926_v23, 5  ;;  %v2397_v18 = vld [vmem:[%s2773_s24 + $0x34] sm:$0xf] }
  0x58   : > { %v266_v23 = vld [vmem:[%s2773_s24 + $0x34] sm:$0xf] }
  0x59   : > { %484 = vrot.lane.b32.xlu0 %v365_v33, %s2708_s27  ;;  %v2366_v33 = vld [vmem:[%s2773_s24 + $0x2c] sm:$0x1]  ;;  %v919_v34 = vsel %vm2808_vm5, %v914_v26, %v918_v13  ;;  %v929_v40 = vsel %vm2808_vm5, %v924_v30, %v928_v31  ;;  %v1477_v31 = vshll.u32 %v2419_v20, 16  ;;  %v386_v35 = vshll.u32 %v266_v23, 16 }
  0x5a   : > { %v1158_v42 = vrot.slane %v2366_v33, 5  ;;  %v390_v36 = vshrl.u32 %v266_v23, 16 }
  0x5b   : > { %486 = vrot.lane.b32.xlu1 %v375_v39, %s2708_s27  ;;  %v2414_v39 = vld [vmem:[%s2773_s24 + $0x30] sm:$0xf]  ;;  %v388_v50 = vrot.slane %v386_v35, 5 }
  0x5c   : > { %v1434_v51 = vshrl.u32 %v2414_v39, 16  ;;  %v1437_v52 = vshll.u32 %v2414_v39, 16  ;;  %v1159_v56 = vsel %vm2781_vm4, %v1157_v41, %v1158_v42  ;;  %v2438_v39 = vld [vmem:[%s2773_s24 + $0x30] sm:$0xe]  ;;  %v382_v41 = vrot.slane %v380_v28, 5 }
  0x5d   : > { %652 = vrot.lane.b32.xlu0 %v605_v46, %s2707_s26  ;;  %v2385_v46 = vrot.slane %v2367_v38, 9  ;;  %v1479_v42 = vrot.slane %v1477_v31, 5  ;;  %v549_v35 = vld [vmem:[%s2773_s24 + $0x30] sm:$0xe] }
  0x5e   : > { %v1436_v62 = vrot.slane %v1434_v51, 4  ;;  %v392_v51 = vrot.slane %v390_v36, 4 }
  0x5f   : > { %654 = vrot.lane.b32.xlu1 %v608_v54, %s2707_s26  ;;  %v2417_v54 = vld [vmem:[%s2773_s24 + $0x3c] sm:$0xf]  ;;  %v1163_v59 = vsel %vm2781_vm4, %v2385_v46, %v1162_v37 }
  0x60   : > { %v1458_v0 = vshrl.u32 %v2417_v54, 16  ;;  %v1461_v1 = vshll.u32 %v2417_v54, 16  ;;  %v268_v46 = vld [vmem:[%s2773_s24 + $0x3c] sm:$0xf] }
  0x61   : > { %656 = vrot.lane.b32.xlu0 %v612_v57, %s2707_s26  ;;  %v1443_v57 = vshll.u32 %v2415_v47, 16  ;;  %v401_v58 = vshrl.u32 %v268_v46, 16 }
  0x62   : > { %v1460_v14 = vrot.slane %v1458_v0, 4  ;;  %v1463_v15 = vrot.slane %v1461_v1, 5  ;;  %v393_v0 = vor.u32 %v392_v51, %v388_v50  ;;  %v410_v1 = vshll.u32 %v269_v53, 16 }
  0x63   : > { %658 = vrot.lane.b32.xlu1 %v615_v63, %s2707_s26  ;;  %v1439_v63 = vrot.slane %v1437_v52, 5  ;;  %v1445_v8 = vrot.slane %v1443_v57, 5  ;;  %v2458_v52 = vrot.slane %v2438_v39, 9  ;;  %v553_v39 = vld [vmem:[%s2773_s24 + $0x40] sm:$0xf] }
  0x64   : > { %v1464_v26 = vor.u32 %v1463_v15, %v1460_v14  ;;  %v394_v14 = vrot.slane %v393_v0, 4  ;;  %v2443_v15 = vld [vmem:[%s2773_s24 + $0x44] sm:$0x1]  ;;  %v412_v17 = vrot.slane %v410_v1, 5 }
  0x65   : > { %753 = vrot.lane.b32.xlu0 %v2322_v6, %s2706_s25  ;;  %v2658_v6 = vld [vmem:[%s3513_s1] sm:$0xff]   ;;  %v1440_v13 = vor.u32 %v1439_v63, %v1436_v62 }
  0x66   : > { %2580 = vmatprep.subr.bf16.mxu0 %v2658_v6  ;;  %2600 = vmatprep.subr.bf16.mxu1 %v2658_v6  ;;  %v1465_v38 = vrot.slane %v1464_v26, 4 }
  0x67   : > { %755 = vrot.lane.b32.xlu1 %v2323_v10, %s2706_s25  ;;  %v1467_v10 = vshll.u32 %v2418_v60, 16  ;;  %2581 = vmatpush3.bf16.msra.mxu0 %v2658_v6 }
  0x68   : > { %2603 = vmatpush3.bf16.msra.mxu1 %v2658_v6 }
  0x69   : > { %757 = vrot.lane.b32.xlu0 %v2324_v16, %s2706_s25  ;;  %v1453_v16 = vshll.u32 %v2416_v7, 16  ;;  %v1469_v21 = vrot.slane %v1467_v10, 5 }
  0x6b   : > { %759 = vrot.lane.b32.xlu1 %v2325_v19, %s2706_s25  ;;  %v1450_v19 = vor.u32 %v1449_v9, %v1445_v8  ;;  %v1455_v30 = vrot.slane %v1453_v16, 5  ;;  %v1474_v33 = vor.u32 %v1473_v22, %v1469_v21 }
  0x6d   : > { %1034 = vrot.lane.b32.xlu0 %v895_v25, %s2709_s28  ;;  %v1441_v25 = vrot.slane %v1440_v13, 4  ;;  %v1451_v32 = vrot.slane %v1450_v19, 4  ;;  %v1475_v48 = vrot.slane %v1474_v33, 4  ;;  %v270_v19 = vld [vmem:[%s2773_s24 + $0x44] sm:$0x1] }
  0x6f   : > { %1036 = vrot.lane.b32.xlu1 %v905_v29, %s2709_s28  ;;  %v2399_v29 = vld [vmem:[%s2773_s24 + $0x40] sm:$0xf]  ;;  %v1446_v37 = vsel %vm2808_vm5, %v1441_v25, %v1445_v8  ;;  %v1456_v47 = vsel %vm2808_vm5, %v1451_v32, %v1455_v30  ;;  %v1480_v63 = vsel %vm2808_vm5, %v1475_v48, %v1479_v42  ;;  %v403_v8 = vrot.slane %v401_v58, 4  ;;  %v550_v30 = vld [vmem:[%s2773_s24 + $0x34] sm:$0xf] }
  0x70   : > { %v551_v42 = vld [vmem:[%s2773_s24 + $0x38] sm:$0x1]  ;;  %v2347_v58 = vld [vmem:[%s2773_s24 + $0x40] sm:$0xf] }
  0x71   : > { %1038 = vrot.lane.b32.xlu0 %v919_v34, %s2709_s28  ;;  %v2439_v34 = vld [vmem:[%s2773_s24 + $0x34] sm:$0xf]  ;;  %v621_v53 = vrot.slane %v551_v42, 5 }
  0x72   : > { %v1706_v45 = vrot.slane %v2439_v34, 5  ;;  %v618_v34 = vrot.slane %v550_v30, 5 }
  0x73   : > { %1040 = vrot.lane.b32.xlu1 %v929_v40, %s2709_s28  ;;  %v379_v40 = vrot.slane %v377_v27, 4 }
  0x74   : > { %v1708_v60 = vrot.slane %v1706_v45, 4  ;;  %v1707_v6 = vsel %vm2781_vm4, %v2458_v52, %v1706_v45  ;;  %v620_v52 = vrot.slane %v618_v34, 4 }
  0x75   : > { %1203 = vrot.lane.b32.xlu0 %v1156_v49, %s2710_s29  ;;  %v267_v49 = vld [vmem:[%s2773_s24 + $0x38] sm:$0x1]  ;;  %v383_v57 = vor.u32 %v382_v41, %v379_v40  ;;  %v229_v40 = vld [vmem:[%s2773_s24 + $0x34] sm:$0xf] }
  0x76   : > { %v396_v62 = vshll.u32 %v267_v49, 16  ;;  %v1710_v10 = vsel %vm2781_vm4, %v1708_v60, %v1709_v61  ;;  %246 = vst.msk [vmem:[#allocation2 + $0x24] sm:$0xf] %vm236_vm6, %v229_v40  ;;  %v625_v49 = vrot.slane %v553_v39, 5 }
  0x77   : > { %1205 = vrot.lane.b32.xlu1 %v1159_v56, %s2710_s29  ;;  %v1470_v56 = vsel %vm2808_vm5, %v1465_v38, %v1469_v21  ;;  %v384_v7 = vrot.slane %v383_v57, 4 }
  0x78   : > { %v398_v11 = vrot.slane %v396_v62, 5  ;;  %v627_v1 = vrot.slane %v625_v49, 4 }
  0x79   : > { %1207 = vrot.lane.b32.xlu0 %v1163_v59, %s2710_s29  ;;  %v404_v59 = vshll.u32 %v268_v46, 16  ;;  %v389_v21 = vsel %vm2808_vm5, %v384_v7, %v388_v50  ;;  %v2312_v46 = vrot.slane %v549_v35, 9  ;;  %v2346_v50 = vld [vmem:[%s2773_s24 + $0x3c] sm:$0xf] }
  0x7a   : > { %v399_v26 = vsel %vm2808_vm5, %v394_v14, %v398_v11  ;;  %v931_v61 = vshrl.u32 %v2346_v50, 16  ;;  %v934_v62 = vshll.u32 %v2346_v50, 16 }
  0x7b   : > { %1209 = vrot.lane.b32.xlu1 %v1166_v3, %s2710_s29  ;;  %v2442_v3 = vld [vmem:[%s2773_s24 + $0x40] sm:$0xf]  ;;  %v406_v9 = vrot.slane %v404_v59, 5  ;;  %v619_v60 = vsel %vm2781_vm4, %v2312_v46, %v618_v34  ;;  %v2328_v34 = vld [vmem:[%s2773_s24 + $0x48] sm:$0xf] }
  0x7c   : > { %v1713_v16 = vrot.slane %v2442_v3, 5  ;;  %v231_v59 = vld [vmem:[%s2773_s24 + $0x40] sm:$0xf]  ;;  %v2349_v3 = vld [vmem:[%s2773_s24 + $0x48] sm:$0xf]  ;;  %v936_v11 = vrot.slane %v934_v62, 5 }
  0x7d   : > { %1304 = vrot.lane.b32.xlu0 %v2396_v12, %s2711_s30  ;;  %v2441_v12 = vld [vmem:[%s2773_s24 + $0x3c] sm:$0xe]  ;;  %v407_v23 = vor.u32 %v406_v9, %v403_v8  ;;  %248 = vst.msk [vmem:[#allocation2 + $0x2c] sm:$0xf] %vm236_vm6, %v231_v59  ;;  %v2350_v9 = vld [vmem:[%s2773_s24 + $0x4c] sm:$0xf] }
  0x7e   : > { %v2459_v22 = vrot.slane %v2441_v12, 9  ;;  %v1715_v27 = vrot.slane %v1713_v16, 4  ;;  %v955_v12 = vshrl.u32 %v2349_v3, 16 }
  0x7f   : > { %1306 = vrot.lane.b32.xlu1 %v2397_v18, %s2711_s30  ;;  %v416_v18 = vrot.slane %v414_v2, 4  ;;  %v408_v32 = vrot.slane %v407_v23, 4 }
  0x80   : > { %v1714_v31 = vsel %vm2781_vm4, %v2459_v22, %v1713_v16  ;;  %v2326_v22 = vld [vmem:[%s2773_s24 + $0x3c] sm:$0xf] }
  0x81   : > { %1308 = vrot.lane.b32.xlu0 %v2398_v24, %s2711_s30  ;;  %v1716_v24 = vrot.slane %v2443_v15, 5  ;;  %v417_v28 = vor.u32 %v416_v18, %v412_v17  ;;  %v413_v45 = vsel %vm2808_vm5, %v408_v32, %v412_v17  ;;  %v964_v18 = vshll.u32 %v2350_v9, 16 }
  0x83   : > { %1310 = vrot.lane.b32.xlu1 %v2399_v29, %s2711_s30  ;;  %v420_v29 = vshll.u32 %v270_v19, 16  ;;  %v1717_v36 = vsel %vm2781_vm4, %v1715_v27, %v1716_v24  ;;  %v968_v19 = vshrl.u32 %v2350_v9, 16  ;;  %v957_v24 = vrot.slane %v955_v12, 4  ;;  %v2327_v27 = vld [vmem:[%s2773_s24 + $0x40] sm:$0xf] }
  0x84   : > { %v966_v30 = vrot.slane %v964_v18, 5 }
  0x85   : > { %1585 = vrot.lane.b32.xlu0 %v1446_v37, %s2712_s4  ;;  %v418_v37 = vrot.slane %v417_v28, 4  ;;  %v422_v38 = vrot.slane %v420_v29, 5 }
  0x86   : > { %v3041_v54 = vpop.permute.xlu0 %745  ;;  %v3043_v55 = vpop.permute.xlu1 %747 }
  0x87   : > { %1587 = vrot.lane.b32.xlu1 %v1456_v47, %s2712_s4  ;;  %v552_v47 = vld [vmem:[%s2773_s24 + $0x3c] sm:$0xe]  ;;  %v423_v51 = vsel %vm2808_vm5, %v418_v37, %v422_v38  ;;  %v2329_v38 = vld [vmem:[%s2773_s24 + $0x4c] sm:$0xf] }
  0x88   : > { %v2313_v57 = vrot.slane %v552_v47, 9 }
  0x89   : > { %1589 = vrot.lane.b32.xlu0 %v1470_v56, %s2712_s4 }
  0x8a   : > { %v645_v5 = vpop.permute.xlu0 %644  ;;  %v626_v8 = vsel %vm2781_vm4, %v2313_v57, %v625_v49  ;;  %v2370_v49 = vld [vmem:[%s2773_s24 + $0x3c] sm:$0xe]  ;;  %v2372_v57 = vld [vmem:[%s2773_s24 + $0x44] sm:$0x1] }
  0x8b   : > { %1591 = vrot.lane.b32.xlu1 %v1480_v63, %s2712_s4  ;;  %v230_v63 = vld [vmem:[%s2773_s24 + $0x3c] sm:$0xf]  ;;  %v2386_v59 = vrot.slane %v2370_v49, 9 }
  0x8c   : > { %v647_v13 = vpop.permute.xlu1 %646  ;;  %247 = vst.msk [vmem:[#allocation2 + $0x28] sm:$0xf] %vm236_vm6, %v230_v63  ;;  %v2420_v63 = vld [vmem:[%s2773_s24 + $0x48] sm:$0xf] }
  0x8d   : > { %1754 = vrot.lane.b32.xlu0 %v1707_v6, %s2713_s5  ;;  %v944_v6 = vshrl.u32 %v2347_v58, 16  ;;  %v1485_v9 = vshll.u32 %v2420_v63, 16 }
  0x8e   : > { %v649_v20 = vpop.permute.xlu0 %648 }
  0x8f   : > { %1756 = vrot.lane.b32.xlu1 %v1710_v10, %s2713_s5  ;;  %v933_v10 = vrot.slane %v931_v61, 4  ;;  %v946_v17 = vrot.slane %v944_v6, 4  ;;  %v2421_v6 = vld [vmem:[%s2773_s24 + $0x4c] sm:$0xf] }
  0x90   : > { %v651_v25 = vpop.permute.xlu1 %650 }
  0x91   : > { %488 = vrot.lane.b32.xlu0 %v389_v21, %s2708_s27  ;;  %v2348_v21 = vld [vmem:[%s2773_s24 + $0x44] sm:$0x1]  ;;  %v937_v23 = vor.u32 %v936_v11, %v933_v10 }
  0x92   : > { %v950_v29 = vshll.u32 %v2348_v21, 16  ;;  %v1487_v21 = vrot.slane %v1485_v9, 5 }
  0x93   : > { %490 = vrot.lane.b32.xlu1 %v399_v26, %s2708_s27  ;;  %v473_v33 = vpop.permute.xlu0 %472  ;;  %v938_v35 = vrot.slane %v937_v23, 4 }
  0x94   : > { %521 = vst.msk [vmem:[#allocation2] sm:$0xf] %vm520_vm8, %v473_v33  ;;  %v2351_v33 = vld [vmem:[%s2773_s24 + $0x50] sm:$0x1]  ;;  %v952_v40 = vrot.slane %v950_v29, 5 }
  0x95   : > { %693 = vst.msk [vmem:[#allocation2] sm:$0xf] %vm692_vm9, %v645_v5  ;;  %v477_v41 = vpop.permute.xlu1 %476  ;;  %1758 = vrot.lane.b32.xlu0 %v1714_v31, %s2713_s5  ;;  %v940_v5 = vshll.u32 %v2347_v58, 16  ;;  %v970_v31 = vrot.slane %v968_v19, 4  ;;  %v974_v42 = vshll.u32 %v2351_v33, 16 }
  0x96   : > { %523 = vst.msk [vmem:[#allocation2 + $0x8] sm:$0xf] %vm520_vm8, %v477_v41  ;;  %v2424_v19 = vld [vmem:[%s2773_s24 + $0x58] sm:$0xf] }
  0x97   : > { %794 = vst.msk [vmem:[#allocation2] sm:$0xf] %vm793_vm10, %v3041_v54  ;;  %1760 = vrot.lane.b32.xlu1 %v1717_v36, %s2713_s5  ;;  %v475_v48 = vpop.permute.xlu0 %474  ;;  %v554_v54 = vld [vmem:[%s2773_s24 + $0x44] sm:$0x1]  ;;  %v942_v16 = vrot.slane %v940_v5, 5  ;;  %v971_v41 = vor.u32 %v970_v31, %v966_v30  ;;  %v1519_v29 = vshrl.u32 %v2424_v19, 16 }
  0x98   : > { %695 = vst.msk [vmem:[#allocation2 + $0x8] sm:$0xf] %vm692_vm9, %v649_v20  ;;  %v628_v2 = vrot.slane %v554_v54, 5  ;;  %v2374_v54 = vld [vmem:[%s2773_s24 + $0x4c] sm:$0xf] }
  0x99   : > { %522 = vst.msk [vmem:[#allocation2 + $0x4] sm:$0xf] %vm520_vm8, %v475_v48  ;;  %v479_v56 = vpop.permute.xlu1 %478  ;;  %492 = vrot.lane.b32.xlu0 %v413_v45, %s2708_s27  ;;  %v947_v28 = vor.u32 %v946_v17, %v942_v16  ;;  %v2371_v45 = vld [vmem:[%s2773_s24 + $0x40] sm:$0xf]  ;;  %v943_v46 = vsel %vm2808_vm5, %v938_v35, %v942_v16  ;;  %v1176_v62 = vrot.slane %v2374_v54, 5  ;;  %v1495_v16 = vshrl.u32 %v2421_v6, 16 }
  0x9a   : > { %694 = vst.msk [vmem:[#allocation2 + $0x4] sm:$0xf] %vm692_vm9, %v647_v13  ;;  %v958_v13 = vshll.u32 %v2349_v3, 16  ;;  %v629_v15 = vsel %vm2781_vm4, %v627_v1, %v628_v2  ;;  %v1172_v2 = vrot.slane %v2372_v57, 5  ;;  %v2375_v3 = vld [vmem:[%s2773_s24 + $0x50] sm:$0x1] }
  0x9b   : > { %524 = vst.msk [vmem:[#allocation2 + $0xc] sm:$0xf] %vm520_vm8, %v479_v56  ;;  %494 = vrot.lane.b32.xlu1 %v423_v51, %s2708_s27  ;;  %v750_v0 = vpop.permute.xlu0 %749  ;;  %v948_v39 = vrot.slane %v947_v28, 4  ;;  %v972_v51 = vrot.slane %v971_v41, 4  ;;  %v1178_v11 = vrot.slane %v1176_v62, 4  ;;  %v1179_v12 = vrot.slane %v2375_v3, 5 }
  0x9c   : > { %795 = vst.msk [vmem:[#allocation2 + $0x4] sm:$0xf] %vm793_vm10, %v3043_v55  ;;  %796 = vst.msk [vmem:[#allocation2 + $0x8] sm:$0xf] %vm793_vm10, %v750_v0  ;;  %v622_v55 = vsel %vm2781_vm4, %v620_v52, %v621_v53  ;;  %v976_v52 = vrot.slane %v974_v42, 5  ;;  %v1169_v53 = vrot.slane %v2371_v45, 5 }
  0x9d   : > { %696 = vst.msk [vmem:[#allocation2 + $0xc] sm:$0xf] %vm692_vm9, %v651_v25  ;;  %v752_v7 = vpop.permute.xlu1 %751  ;;  %660 = vrot.lane.b32.xlu0 %v619_v60, %s2707_s26  ;;  %v960_v25 = vrot.slane %v958_v13, 5  ;;  %v953_v50 = vsel %vm2808_vm5, %v948_v39, %v952_v40  ;;  %v2373_v60 = vld [vmem:[%s2773_s24 + $0x48] sm:$0xe]  ;;  %v1515_v28 = vshll.u32 %v2424_v19, 16 }
  0x9e   : > { %797 = vst.msk [vmem:[#allocation2 + $0xc] sm:$0xf] %vm793_vm10, %v752_v7  ;;  %v977_v0 = vsel %vm2808_vm5, %v972_v51, %v976_v52  ;;  %v1171_v1 = vrot.slane %v1169_v53, 4  ;;  %v2387_v5 = vrot.slane %v2373_v60, 9  ;;  %v1170_v7 = vsel %vm2781_vm4, %v2386_v59, %v1169_v53  ;;  %v2423_v13 = vld [vmem:[%s2773_s24 + $0x54] sm:$0xf] }
  0x9f   : > { %662 = vrot.lane.b32.xlu1 %v622_v55, %s2707_s26  ;;  %v1027_v14 = vpop.permute.xlu0 %1026  ;;  %v961_v36 = vor.u32 %v960_v25, %v957_v24  ;;  %v1509_v23 = vshll.u32 %v2423_v13, 16  ;;  %v1180_v25 = vsel %vm2781_vm4, %v1178_v11, %v1179_v12  ;;  %v2422_v31 = vld [vmem:[%s2773_s24 + $0x50] sm:$0x1]  ;;  %v271_v39 = vld [vmem:[%s2773_s24 + $0x48] sm:$0xf]  ;;  %v3191_v42 = vrot.slane %v1515_v28, 5 }
  0xa0   : > { %1075 = vst.msk [vmem:[#allocation2] sm:$0xf] %vm1074_vm11, %v1027_v14  ;;  %v1173_v14 = vsel %vm2781_vm4, %v1171_v1, %v1172_v2  ;;  %v1177_v18 = vsel %vm2781_vm4, %v2387_v5, %v1176_v62  ;;  %v1501_v41 = vshll.u32 %v2422_v31, 16  ;;  %v272_v45 = vld [vmem:[%s2773_s24 + $0x4c] sm:$0xf]  ;;  %v425_v51 = vshrl.u32 %v271_v39, 16 }
  0xa1   : > { %v1029_v20 = vpop.permute.xlu1 %1028  ;;  %664 = vrot.lane.b32.xlu0 %v626_v8, %s2707_s26  ;;  %v962_v47 = vrot.slane %v961_v36, 4  ;;  %v1482_v8 = vshrl.u32 %v2420_v63, 16  ;;  %v1511_v36 = vrot.slane %v1509_v23, 5  ;;  %v428_v52 = vshll.u32 %v271_v39, 16  ;;  %v2403_v57 = vld [vmem:[%s2773_s24 + $0x58] sm:$0xf] }
  0xa2   : > { %1076 = vst.msk [vmem:[#allocation2 + $0x4] sm:$0xf] %vm1074_vm11, %v1029_v20  ;;  %v434_v54 = vshll.u32 %v272_v45, 16  ;;  %v1503_v59 = vrot.slane %v1501_v41, 5  ;;  %v2445_v63 = vld [vmem:[%s2773_s24 + $0x4c] sm:$0xf] }
  0xa3   : > { %666 = vrot.lane.b32.xlu1 %v629_v15, %s2707_s26  ;;  %v1031_v26 = vpop.permute.xlu0 %1030  ;;  %v967_v58 = vsel %vm2808_vm5, %v962_v47, %v966_v30  ;;  %v1491_v15 = vshll.u32 %v2421_v6, 16  ;;  %v1484_v20 = vrot.slane %v1482_v8, 4  ;;  %v2446_v2 = vld [vmem:[%s2773_s24 + $0x50] sm:$0x1]  ;;  %v2444_v3 = vld [vmem:[%s2773_s24 + $0x48] sm:$0xe] }
  0xa4   : > { %1077 = vst.msk [vmem:[#allocation2 + $0x8] sm:$0xf] %vm1074_vm11, %v1031_v26  ;;  %v430_v5 = vrot.slane %v428_v52, 5  ;;  %v3211_v8 = vrot.slane %v434_v54, 5 }
  0xa5   : > { %v1033_v32 = vpop.permute.xlu1 %1032  ;;  %761 = vrot.lane.b32.xlu0 %v2326_v22, %s2706_s25  ;;  %v1506_v22 = vshrl.u32 %v2423_v13, 16  ;;  %v3179_v26 = vrot.slane %v1491_v15, 5  ;;  %v1488_v33 = vor.u32 %v1487_v21, %v1484_v20  ;;  %v1720_v13 = vrot.slane %v2445_v63, 5  ;;  %v232_v15 = vld [vmem:[%s2773_s24 + $0x48] sm:$0xf] }
  0xa6   : > { %1078 = vst.msk [vmem:[#allocation2 + $0xc] sm:$0xf] %vm1074_vm11, %v1033_v32  ;;  %v2400_v32 = vld [vmem:[%s2773_s24 + $0x48] sm:$0xf] }
  0xa7   : > { %763 = vrot.lane.b32.xlu1 %v2327_v27, %s2706_s25  ;;  %v1196_v37 = vpop.permute.xlu0 %1195  ;;  %v1497_v27 = vrot.slane %v1495_v16, 4  ;;  %v1508_v35 = vrot.slane %v1506_v22, 4  ;;  %v1489_v49 = vrot.slane %v1488_v33, 4  ;;  %249 = vst.msk [vmem:[#allocation2 + $0x30] sm:$0xf] %vm236_vm6, %v232_v15  ;;  %v1722_v28 = vrot.slane %v1720_v13, 4 }
  0xa8   : > { %1244 = vst.msk [vmem:[#allocation2] sm:$0xf] %vm1243_vm12, %v1196_v37 }
  0xa9   : > { %v1198_v43 = vpop.permute.xlu1 %1197  ;;  %765 = vrot.lane.b32.xlu0 %v2328_v34, %s2706_s25  ;;  %v2425_v34 = vld [vmem:[%s2773_s24 + $0x5c] sm:$0x1]  ;;  %v1498_v40 = vor.u32 %v1497_v27, %v3179_v26 }
  0xaa   : > { %1245 = vst.msk [vmem:[#allocation2 + $0x4] sm:$0xf] %vm1243_vm12, %v1198_v43  ;;  %v1521_v43 = vrot.slane %v1519_v29, 4  ;;  %v1525_v47 = vshll.u32 %v2425_v34, 16  ;;  %v2448_v29 = vld [vmem:[%s2773_s24 + $0x58] sm:$0xf] }
  0xab   : > { %767 = vrot.lane.b32.xlu1 %v2329_v38, %s2706_s25  ;;  %v1200_v48 = vpop.permute.xlu0 %1199  ;;  %v2401_v38 = vld [vmem:[%s2773_s24 + $0x4c] sm:$0xf] }
  0xac   : > { %1246 = vst.msk [vmem:[#allocation2 + $0x8] sm:$0xf] %vm1243_vm12, %v1200_v48  ;;  %v2402_v48 = vld [vmem:[%s2773_s24 + $0x54] sm:$0xf]  ;;  %v1522_v60 = vor.u32 %v1521_v43, %v3191_v42  ;;  %v1527_v62 = vrot.slane %v1525_v47, 5 }
  0xad   : > { %v1202_v56 = vpop.permute.xlu1 %1201  ;;  %1042 = vrot.lane.b32.xlu0 %v943_v46, %s2709_s28  ;;  %v2447_v43 = vld [vmem:[%s2773_s24 + $0x54] sm:$0xe] }
  0xae   : > { %1247 = vst.msk [vmem:[#allocation2 + $0xc] sm:$0xf] %vm1243_vm12, %v1202_v56  ;;  %v438_v56 = vshrl.u32 %v272_v45, 16  ;;  %v1523_v12 = vrot.slane %v1522_v60, 4 }
  0xaf   : > { %1044 = vrot.lane.b32.xlu1 %v953_v50, %s2709_s28  ;;  %v1297_v61 = vpop.permute.xlu0 %1296  ;;  %v1512_v50 = vor.u32 %v1511_v36, %v1508_v35  ;;  %v2449_v36 = vld [vmem:[%s2773_s24 + $0x5c] sm:$0x1] }
  0xb0   : > { %1345 = vst.msk [vmem:[#allocation2] sm:$0xf] %vm1344_vm13, %v1297_v61  ;;  %v440_v9 = vrot.slane %v438_v56, 4  ;;  %v1528_v27 = vsel %vm2808_vm5, %v1523_v12, %v1527_v62 }
  0xb1   : > { %v1299_v55 = vpop.permute.xlu1 %1298  ;;  %1046 = vrot.lane.b32.xlu0 %v967_v58, %s2709_s28  ;;  %v1499_v58 = vrot.slane %v1498_v40, 4  ;;  %v1513_v1 = vrot.slane %v1512_v50, 4 }
  0xb2   : > { %1346 = vst.msk [vmem:[#allocation2 + $0x4] sm:$0xf] %vm1344_vm13, %v1299_v55  ;;  %v427_v55 = vrot.slane %v425_v51, 4  ;;  %v276_v51 = vld [vmem:[%s2773_s24 + $0x5c] sm:$0x1] }
  0xb3   : > { %1048 = vrot.lane.b32.xlu1 %v977_v0, %s2709_s28  ;;  %v1301_v10 = vpop.permute.xlu0 %1300  ;;  %v1494_v0 = vsel %vm2808_vm5, %v1489_v49, %v3179_v26  ;;  %v1504_v11 = vsel %vm2808_vm5, %v1499_v58, %v1503_v59  ;;  %v1518_v19 = vsel %vm2808_vm5, %v1513_v1, %v3191_v42  ;;  %v1727_v42 = vrot.slane %v2448_v29, 5  ;;  %v234_v49 = vld [vmem:[%s2773_s24 + $0x54] sm:$0xf] }
  0xb4   : > { %1347 = vst.msk [vmem:[#allocation2 + $0x8] sm:$0xf] %vm1344_vm13, %v1301_v10  ;;  %v274_v10 = vld [vmem:[%s2773_s24 + $0x54] sm:$0xf]  ;;  %v431_v20 = vor.u32 %v430_v5, %v427_v55  ;;  %v555_v55 = vld [vmem:[%s2773_s24 + $0x48] sm:$0xe] }
  0xb5   : > { %v1303_v17 = vpop.permute.xlu1 %1302  ;;  %1211 = vrot.lane.b32.xlu0 %v1170_v7, %s2710_s29  ;;  %v273_v7 = vld [vmem:[%s2773_s24 + $0x50] sm:$0x1]  ;;  %v449_v21 = vshrl.u32 %v274_v10, 16  ;;  %v452_v22 = vshll.u32 %v274_v10, 16  ;;  %251 = vst.msk [vmem:[#allocation2 + $0x38] sm:$0xf] %vm236_vm6, %v234_v49 }
  0xb6   : > { %1348 = vst.msk [vmem:[#allocation2 + $0xc] sm:$0xf] %vm1344_vm13, %v1303_v17  ;;  %v2460_v17 = vrot.slane %v2444_v3, 9  ;;  %v444_v26 = vshll.u32 %v273_v7, 16  ;;  %v432_v35 = vrot.slane %v431_v20, 4  ;;  %v1729_v59 = vrot.slane %v1727_v42, 4 }
  0xb7   : > { %1213 = vrot.lane.b32.xlu1 %v1173_v14, %s2710_s29  ;;  %v1578_v24 = vpop.permute.xlu0 %1577  ;;  %v233_v14 = vld [vmem:[%s2773_s24 + $0x4c] sm:$0xf] }
  0xb8   : > { %1626 = vst.msk [vmem:[#allocation2] sm:$0xf] %vm1625_vm14, %v1578_v24  ;;  %v1723_v24 = vrot.slane %v2446_v2, 5  ;;  %v1721_v34 = vsel %vm2781_vm4, %v2460_v17, %v1720_v13  ;;  %v446_v41 = vrot.slane %v444_v26, 5  ;;  %v437_v52 = vsel %vm2808_vm5, %v432_v35, %v3211_v8  ;;  %v2352_v17 = vld [vmem:[%s2773_s24 + $0x54] sm:$0xf] }
  0xb9   : > { %v1580_v30 = vpop.permute.xlu1 %1579  ;;  %1215 = vrot.lane.b32.xlu0 %v1177_v18, %s2710_s29  ;;  %v275_v18 = vld [vmem:[%s2773_s24 + $0x58] sm:$0xf]  ;;  %250 = vst.msk [vmem:[#allocation2 + $0x34] sm:$0xf] %vm236_vm6, %v233_v14  ;;  %v2314_v13 = vrot.slane %v555_v55, 9  ;;  %v979_v26 = vshrl.u32 %v2352_v17, 16 }
  0xba   : > { %1627 = vst.msk [vmem:[#allocation2 + $0x4] sm:$0xf] %vm1625_vm14, %v1580_v30  ;;  %v458_v30 = vshll.u32 %v275_v18, 16  ;;  %v462_v31 = vshrl.u32 %v275_v18, 16  ;;  %v1724_v45 = vsel %vm2781_vm4, %v1722_v28, %v1723_v24  ;;  %v558_v14 = vld [vmem:[%s2773_s24 + $0x54] sm:$0xe] }
  0xbb   : > { %1217 = vrot.lane.b32.xlu1 %v1180_v25, %s2710_s29  ;;  %v1582_v37 = vpop.permute.xlu0 %1581  ;;  %v441_v25 = vor.u32 %v440_v9, %v3211_v8  ;;  %v559_v9 = vld [vmem:[%s2773_s24 + $0x58] sm:$0xf]  ;;  %v2333_v55 = vld [vmem:[%s2773_s24 + $0x64] sm:$0xf] }
  0xbc   : > { %1628 = vst.msk [vmem:[#allocation2 + $0x8] sm:$0xf] %vm1625_vm14, %v1582_v37  ;;  %v451_v37 = vrot.slane %v449_v21, 4  ;;  %v464_v47 = vrot.slane %v462_v31, 4  ;;  %v560_v21 = vld [vmem:[%s2773_s24 + $0x5c] sm:$0x1] }
  0xbd   : > { %v1584_v46 = vpop.permute.xlu1 %1583  ;;  %1312 = vrot.lane.b32.xlu0 %v2400_v32, %s2711_s30  ;;  %v442_v40 = vrot.slane %v441_v25, 4  ;;  %v2353_v24 = vld [vmem:[%s2773_s24 + $0x58] sm:$0xf]  ;;  %v2355_v31 = vld [vmem:[%s2773_s24 + $0x60] sm:$0xf] }
  0xbe   : > { %1629 = vst.msk [vmem:[#allocation2 + $0xc] sm:$0xf] %vm1625_vm14, %v1584_v46  ;;  %v460_v46 = vrot.slane %v458_v30, 5  ;;  %v642_v30 = vrot.slane %v560_v21, 5  ;;  %v2378_v21 = vld [vmem:[%s2773_s24 + $0x5c] sm:$0x1] }
  0xbf   : > { %1314 = vrot.lane.b32.xlu1 %v2401_v38, %s2711_s30  ;;  %v1747_v53 = vpop.permute.xlu0 %1746  ;;  %v454_v38 = vrot.slane %v452_v22, 5  ;;  %v447_v58 = vsel %vm2808_vm5, %v442_v40, %v446_v41  ;;  %v1003_v40 = vshrl.u32 %v2355_v31, 16  ;;  %v1006_v41 = vshll.u32 %v2355_v31, 16  ;;  %v2381_v31 = vld [vmem:[%s2773_s24 + $0x68] sm:$0x1] }
  0xc0   : > { %1795 = vst.msk [vmem:[#allocation2] sm:$0xf] %vm1794_vm15, %v1747_v53  ;;  %v2461_v53 = vrot.slane %v2447_v43, 9  ;;  %v465_v60 = vor.u32 %v464_v47, %v460_v46 }
  0xc1   : > { %v1749_v61 = vpop.permute.xlu1 %1748  ;;  %1316 = vrot.lane.b32.xlu0 %v2402_v48, %s2711_s30  ;;  %v235_v48 = vld [vmem:[%s2773_s24 + $0x58] sm:$0xf]  ;;  %v455_v54 = vor.u32 %v454_v38, %v451_v37  ;;  %v2356_v37 = vld [vmem:[%s2773_s24 + $0x64] sm:$0xf]  ;;  %v981_v38 = vrot.slane %v979_v26, 4 }
  0xc2   : > { %1796 = vst.msk [vmem:[#allocation2 + $0x4] sm:$0xf] %vm1794_vm15, %v1749_v61  ;;  %v468_v61 = vshll.u32 %v276_v51, 16  ;;  %v1728_v1 = vsel %vm2781_vm4, %v2461_v53, %v1727_v42  ;;  %v1012_v47 = vshll.u32 %v2356_v37, 16  ;;  %v2330_v51 = vld [vmem:[%s2773_s24 + $0x54] sm:$0xf] }
  0xc3   : > { %1318 = vrot.lane.b32.xlu1 %v2403_v57, %s2711_s30  ;;  %v481_v6 = vpop.permute.xlu0 %480  ;;  %252 = vst.msk [vmem:[#allocation2 + $0x3c] sm:$0xf] %vm236_vm6, %v235_v48  ;;  %v1730_v57 = vrot.slane %v2449_v36, 5  ;;  %v456_v2 = vrot.slane %v455_v54, 4  ;;  %v1016_v48 = vshrl.u32 %v2356_v37, 16  ;;  %v1005_v53 = vrot.slane %v1003_v40, 4 }
  0xc4   : > { %525 = vst.msk [vmem:[#allocation2 + $0x10] sm:$0xf] %vm520_vm8, %v481_v6  ;;  %v466_v6 = vrot.slane %v465_v60, 4  ;;  %v470_v7 = vrot.slane %v468_v61, 5  ;;  %v1008_v54 = vrot.slane %v1006_v41, 5  ;;  %v1014_v60 = vrot.slane %v1012_v47, 5 }
  0xc5   : > { %v483_v16 = vpop.permute.xlu1 %482  ;;  %1593 = vrot.lane.b32.xlu0 %v1494_v0, %s2712_s4  ;;  %v556_v0 = vld [vmem:[%s2773_s24 + $0x4c] sm:$0xf]  ;;  %v1731_v5 = vsel %vm2781_vm4, %v1729_v59, %v1730_v57  ;;  %v461_v12 = vsel %vm2808_vm5, %v456_v2, %v460_v46  ;;  %v2331_v57 = vld [vmem:[%s2773_s24 + $0x58] sm:$0xf]  ;;  %v1018_v61 = vrot.slane %v1016_v48, 4  ;;  %v1193_v40 = vrot.slane %v2381_v31, 5 }
  0xc6   : > { %526 = vst.msk [vmem:[#allocation2 + $0x14] sm:$0xf] %vm520_vm8, %v483_v16  ;;  %v632_v8 = vrot.slane %v556_v0, 5  ;;  %v639_v16 = vrot.slane %v559_v9, 5  ;;  %v471_v18 = vsel %vm2808_vm5, %v466_v6, %v470_v7  ;;  %v2332_v0 = vld [vmem:[%s2773_s24 + $0x60] sm:$0xf]  ;;  %v1009_v2 = vor.u32 %v1008_v54, %v1005_v53 }
  0xc7   : > { %1595 = vrot.lane.b32.xlu1 %v1504_v11, %s2712_s4  ;;  %v1751_v23 = vpop.permute.xlu0 %1750  ;;  %v557_v11 = vld [vmem:[%s2773_s24 + $0x50] sm:$0x1]  ;;  %v1019_v7 = vor.u32 %v1018_v61, %v1014_v60  ;;  %v2429_v41 = vld [vmem:[%s2773_s24 + $0x6c] sm:$0xf]  ;;  %v2428_v61 = vld [vmem:[%s2773_s24 + $0x68] sm:$0x1] }
  0xc8   : > { %1797 = vst.msk [vmem:[#allocation2 + $0x8] sm:$0xf] %vm1794_vm15, %v1751_v23  ;;  %v635_v20 = vrot.slane %v557_v11, 5  ;;  %v2315_v23 = vrot.slane %v558_v14, 9  ;;  %v633_v25 = vsel %vm2781_vm4, %v2314_v13, %v632_v8  ;;  %v641_v29 = vrot.slane %v639_v16, 4 }
  0xc9   : > { %v1753_v32 = vpop.permute.xlu1 %1752  ;;  %1597 = vrot.lane.b32.xlu0 %v1518_v19, %s2712_s4  ;;  %v2657_v33 = vld [vmem:[#allocation2] sm:$0xff]   ;;  %v634_v19 = vrot.slane %v632_v8, 4  ;;  %v2376_v14 = vld [vmem:[%s2773_s24 + $0x54] sm:$0xe]  ;;  %v2430_v48 = vld [vmem:[%s2773_s24 + $0x70] sm:$0xf] }
  0xca   : > { %1798 = vst.msk [vmem:[#allocation2 + $0xc] sm:$0xf] %vm1794_vm15, %v1753_v32  ;;  %2582 = vmatprep.mubr.msk.bf16.mxu0 %vm1887_vm0, %v2657_v33  ;;  %v988_v33 = vshll.u32 %v2353_v24, 16  ;;  %v640_v36 = vsel %vm2781_vm4, %v2315_v23, %v639_v16  ;;  %v643_v43 = vsel %vm2781_vm4, %v641_v29, %v642_v30  ;;  %v1020_v16 = vrot.slane %v1019_v7, 4  ;;  %v2454_v31 = vld [vmem:[%s2773_s24 + $0x70] sm:$0xf] }
  0xcb   : > { %1599 = vrot.lane.b32.xlu1 %v1528_v27, %s2712_s4  ;;  %v485_v39 = vpop.permute.xlu0 %484  ;;  %v982_v27 = vshll.u32 %v2352_v17, 16  ;;  %v636_v32 = vsel %vm2781_vm4, %v634_v19, %v635_v20  ;;  %v2380_v19 = vld [vmem:[%s2773_s24 + $0x64] sm:$0xf]  ;;  %v2388_v23 = vrot.slane %v2376_v14, 9  ;;  %v1186_v30 = vrot.slane %v2378_v21, 5 }
  0xcc   : > { %527 = vst.msk [vmem:[#allocation2 + $0x18] sm:$0xf] %vm520_vm8, %v485_v39  ;;  %v1190_v26 = vrot.slane %v2380_v19, 5  ;;  %v2407_v14 = vld [vmem:[%s2773_s24 + $0x70] sm:$0xf] }
  0xcd   : > { %v487_v50 = vpop.permute.xlu1 %486  ;;  %1762 = vrot.lane.b32.xlu0 %v1721_v34, %s2713_s5  ;;  %v992_v34 = vshrl.u32 %v2353_v24, 16  ;;  %v984_v39 = vrot.slane %v982_v27, 5  ;;  %v2379_v24 = vld [vmem:[%s2773_s24 + $0x60] sm:$0xe] }
  0xce   : > { %528 = vst.msk [vmem:[#allocation2 + $0x1c] sm:$0xf] %vm520_vm8, %v487_v50  ;;  %v2354_v50 = vld [vmem:[%s2773_s24 + $0x5c] sm:$0x1]  ;;  %v2426_v27 = vld [vmem:[%s2773_s24 + $0x60] sm:$0xf] }
  0xcf   : > { %1764 = vrot.lane.b32.xlu1 %v1724_v45, %s2713_s5  ;;  %v653_v56 = vpop.permute.xlu0 %652  ;;  %v990_v45 = vrot.slane %v988_v33, 5  ;;  %v994_v46 = vrot.slane %v992_v34, 4  ;;  %v998_v59 = vshll.u32 %v2354_v50, 16  ;;  %v2389_v33 = vrot.slane %v2379_v24, 9  ;;  %v2427_v34 = vld [vmem:[%s2773_s24 + $0x64] sm:$0xf] }
  0xd0   : > { %697 = vst.msk [vmem:[#allocation2 + $0x10] sm:$0xf] %vm692_vm9, %v653_v56  ;;  %v1533_v37 = vshll.u32 %v2426_v27, 16  ;;  %v2450_v24 = vld [vmem:[%s2773_s24 + $0x60] sm:$0xe] }
  0xd1   : > { %v655_v62 = vpop.permute.xlu1 %654  ;;  %496 = vrot.lane.b32.xlu0 %v437_v52, %s2708_s27  ;;  %v2659_v63 = vld [vmem:[#allocation2 + $0x8] sm:$0xff]   ;;  %v985_v52 = vor.u32 %v984_v39, %v981_v38  ;;  %v1000_v6 = vrot.slane %v998_v59, 5  ;;  %v1192_v39 = vrot.slane %v1190_v26, 4  ;;  %v1191_v47 = vsel %vm2781_vm4, %v2389_v33, %v1190_v26 }
  0xd2   : > { %698 = vst.msk [vmem:[#allocation2 + $0x14] sm:$0xf] %vm692_vm9, %v655_v62  ;;  %2583 = vmatmul.mubr.msk.bf16.vlgmr.msra.gmra.mxu0 %vm1887_vm0, %v2659_v63  ;;  %v2357_v63 = vld [vmem:[%s2773_s24 + $0x68] sm:$0x1]  ;;  %v1535_v50 = vrot.slane %v1533_v37, 5  ;;  %v1567_v59 = vshrl.u32 %v2430_v48, 16 }
  0xd3   : > { %498 = vrot.lane.b32.xlu1 %v447_v58, %s2708_s27  ;;  %v657_v3 = vpop.permute.xlu0 %656  ;;  %v995_v58 = vor.u32 %v994_v46, %v990_v45  ;;  %v1022_v8 = vshll.u32 %v2357_v63, 16  ;;  %v1194_v54 = vsel %vm2781_vm4, %v1192_v39, %v1193_v40  ;;  %v2462_v33 = vrot.slane %v2450_v24, 9 }
  0xd4   : > { %699 = vst.msk [vmem:[#allocation2 + $0x18] sm:$0xf] %vm692_vm9, %v657_v3  ;;  %v1569_v7 = vrot.slane %v1567_v59, 4  ;;  %v1741_v39 = vrot.slane %v2454_v31, 5 }
  0xd5   : > { %v659_v10 = vpop.permute.xlu1 %658  ;;  %1766 = vrot.lane.b32.xlu0 %v1728_v1, %s2713_s5  ;;  %v986_v1 = vrot.slane %v985_v52, 4  ;;  %v1024_v17 = vrot.slane %v1022_v8, 5  ;;  %v1557_v52 = vshll.u32 %v2429_v41, 16 }
  0xd6   : > { %700 = vst.msk [vmem:[#allocation2 + $0x1c] sm:$0xf] %vm692_vm9, %v659_v10  ;;  %v2377_v10 = vld [vmem:[%s2773_s24 + $0x58] sm:$0xf] }
  0xd7   : > { %1768 = vrot.lane.b32.xlu1 %v1731_v5, %s2713_s5  ;;  %v754_v15 = vpop.permute.xlu0 %753  ;;  %v996_v5 = vrot.slane %v995_v58, 4  ;;  %v991_v11 = vsel %vm2808_vm5, %v986_v1, %v990_v45  ;;  %v1543_v45 = vshrl.u32 %v2427_v34, 16  ;;  %v1563_v58 = vshll.u32 %v2430_v48, 16 }
  0xd8   : > { %798 = vst.msk [vmem:[#allocation2 + $0x10] sm:$0xf] %vm793_vm10, %v754_v15  ;;  %v1559_v1 = vrot.slane %v1557_v52, 5 }
  0xd9   : > { %v756_v22 = vpop.permute.xlu1 %755  ;;  %500 = vrot.lane.b32.xlu0 %v461_v12, %s2708_s27  ;;  %v1010_v12 = vrot.slane %v1009_v2, 4  ;;  %v1001_v15 = vsel %vm2808_vm5, %v996_v5, %v1000_v6  ;;  %v1549_v5 = vshll.u32 %v2428_v61, 16  ;;  %v1565_v6 = vrot.slane %v1563_v58, 5 }
  0xda   : > { %799 = vst.msk [vmem:[#allocation2 + $0x14] sm:$0xf] %vm793_vm10, %v756_v22 }
  0xdb   : > { %502 = vrot.lane.b32.xlu1 %v471_v18, %s2708_s27  ;;  %v758_v28 = vpop.permute.xlu0 %757  ;;  %v1183_v18 = vrot.slane %v2377_v10, 5  ;;  %v1015_v22 = vsel %vm2808_vm5, %v1010_v12, %v1014_v60  ;;  %v2406_v10 = vld [vmem:[%s2773_s24 + $0x6c] sm:$0xf] }
  0xdc   : > { %800 = vst.msk [vmem:[#allocation2 + $0x18] sm:$0xf] %vm793_vm10, %v758_v28  ;;  %v1025_v28 = vsel %vm2808_vm5, %v1020_v16, %v1024_v17  ;;  %v1551_v16 = vrot.slane %v1549_v5, 5  ;;  %v1570_v17 = vor.u32 %v1569_v7, %v1565_v6 }
  0xdd   : > { %v760_v35 = vpop.permute.xlu1 %759  ;;  %668 = vrot.lane.b32.xlu0 %v633_v25, %s2707_s26  ;;  %v1185_v29 = vrot.slane %v1183_v18, 4 }
  0xde   : > { %801 = vst.msk [vmem:[#allocation2 + $0x1c] sm:$0xf] %vm793_vm10, %v760_v35  ;;  %v1184_v35 = vsel %vm2781_vm4, %v2388_v23, %v1183_v18  ;;  %v1571_v26 = vrot.slane %v1570_v17, 4 }
  0xdf   : > { %670 = vrot.lane.b32.xlu1 %v636_v32, %s2707_s26  ;;  %v1035_v42 = vpop.permute.xlu0 %1034 }
  0xe0   : > { %1079 = vst.msk [vmem:[#allocation2 + $0x10] sm:$0xf] %vm1074_vm11, %v1035_v42  ;;  %v1187_v42 = vsel %vm2781_vm4, %v1185_v29, %v1186_v30  ;;  %v2452_v30 = vld [vmem:[%s2773_s24 + $0x68] sm:$0x1] }
  0xe1   : > { %v1037_v49 = vpop.permute.xlu1 %1036  ;;  %672 = vrot.lane.b32.xlu0 %v640_v36, %s2707_s26  ;;  %v1530_v36 = vshrl.u32 %v2426_v27, 16 }
  0xe2   : > { %1080 = vst.msk [vmem:[#allocation2 + $0x14] sm:$0xf] %vm1074_vm11, %v1037_v49 }
  0xe3   : > { %674 = vrot.lane.b32.xlu1 %v643_v43, %s2707_s26  ;;  %v1039_v56 = vpop.permute.xlu0 %1038  ;;  %v1539_v43 = vshll.u32 %v2427_v34, 16  ;;  %v1532_v49 = vrot.slane %v1530_v36, 4  ;;  %s2303_s26 = sshll.u32 %s3531_s13, 1 }
  0xe4   : > { %1081 = vst.msk [vmem:[#allocation2 + $0x18] sm:$0xf] %vm1074_vm11, %v1039_v56  ;;  %s212_s27 = sadd.s32 %s2303_s26, %s3535_s12 }
  0xe5   : > { %v1041_v62 = vpop.permute.xlu1 %1040  ;;  %769 = vrot.lane.b32.xlu0 %v2330_v51, %s2706_s25  ;;  %v1554_v51 = vshrl.u32 %v2429_v41, 16  ;;  %v1541_v56 = vrot.slane %v1539_v43, 5  ;;  %v1536_v63 = vor.u32 %v1535_v50, %v1532_v49 }
  0xe6   : > { %1082 = vst.msk [vmem:[#allocation2 + $0x1c] sm:$0xf] %vm1074_vm11, %v1041_v62  ;;  %v2404_v62 = vld [vmem:[%s2773_s24 + $0x60] sm:$0xf] }
  0xe7   : > { %771 = vrot.lane.b32.xlu1 %v2331_v57, %s2706_s25  ;;  %v1204_v3 = vpop.permute.xlu0 %1203  ;;  %v1545_v57 = vrot.slane %v1543_v45, 4 }
  0xe8   : > { %1248 = vst.msk [vmem:[#allocation2 + $0x10] sm:$0xf] %vm1243_vm12, %v1204_v3  ;;  %v2405_v3 = vld [vmem:[%s2773_s24 + $0x64] sm:$0xf] }
  0xe9   : > { %v1206_v9 = vpop.permute.xlu1 %1205  ;;  %773 = vrot.lane.b32.xlu0 %v2332_v0, %s2706_s25  ;;  %v1556_v0 = vrot.slane %v1554_v51, 4 }
  0xea   : > { %1249 = vst.msk [vmem:[#allocation2 + $0x14] sm:$0xf] %vm1243_vm12, %v1206_v9  ;;  %v2431_v9 = vld [vmem:[%s2773_s24 + $0x74] sm:$0x1] }
  0xeb   : > { %775 = vrot.lane.b32.xlu1 %v2333_v55, %s2706_s25  ;;  %v1208_v13 = vpop.permute.xlu0 %1207  ;;  %v1546_v55 = vor.u32 %v1545_v57, %v1541_v56  ;;  %v1560_v12 = vor.u32 %v1559_v1, %v1556_v0  ;;  %v1573_v18 = vshll.u32 %v2431_v9, 16  ;;  %s3481_s25 = scalar_lea.vmem %s3514_s2, %s2302_s22 }
  0xec   : > { %1250 = vst.msk [vmem:[#allocation2 + $0x18] sm:$0xf] %vm1243_vm12, %v1208_v13 }
  0xed   : > { %v1210_v20 = vpop.permute.xlu1 %1209  ;;  %1050 = vrot.lane.b32.xlu0 %v991_v11, %s2709_s28  ;;  %v1537_v11 = vrot.slane %v1536_v63, 4  ;;  %v1575_v27 = vrot.slane %v1573_v18, 5 }
  0xee   : > { %1251 = vst.msk [vmem:[#allocation2 + $0x1c] sm:$0xf] %vm1243_vm12, %v1210_v20  ;;  %v2451_v20 = vld [vmem:[%s2773_s24 + $0x64] sm:$0xf] }
  0xef   : > { %1052 = vrot.lane.b32.xlu1 %v1001_v15, %s2709_s28  ;;  %v1305_v25 = vpop.permute.xlu0 %1304  ;;  %v1547_v15 = vrot.slane %v1546_v55, 4  ;;  %v1542_v21 = vsel %vm2808_vm5, %v1537_v11, %v1541_v56  ;;  %v1576_v36 = vsel %vm2808_vm5, %v1571_v26, %v1575_v27 }
  0xf0   : > { %1349 = vst.msk [vmem:[#allocation2 + $0x10] sm:$0xf] %vm1344_vm13, %v1305_v25 }
  0xf1   : > { %v1307_v32 = vpop.permute.xlu1 %1306  ;;  %1054 = vrot.lane.b32.xlu0 %v1015_v22, %s2709_s28  ;;  %v1561_v22 = vrot.slane %v1560_v12, 4  ;;  %v1552_v25 = vsel %vm2808_vm5, %v1547_v15, %v1551_v16 }
  0xf2   : > { %1350 = vst.msk [vmem:[#allocation2 + $0x14] sm:$0xf] %vm1344_vm13, %v1307_v32 }
  0xf3   : > { %1056 = vrot.lane.b32.xlu1 %v1025_v28, %s2709_s28  ;;  %v1309_v38 = vpop.permute.xlu0 %1308  ;;  %v1734_v28 = vrot.slane %v2451_v20, 5  ;;  %v1566_v32 = vsel %vm2808_vm5, %v1561_v22, %v1565_v6  ;;  %s2304_s28 = sshll.u32 %s212_s27, 1 }
  0xf4   : > { %1351 = vst.msk [vmem:[#allocation2 + $0x18] sm:$0xf] %vm1344_vm13, %v1309_v38  ;;  %v1737_v38 = vrot.slane %v2452_v30, 5 }
  0xf5   : > { %v1311_v46 = vpop.permute.xlu1 %1310  ;;  %1219 = vrot.lane.b32.xlu0 %v1184_v35, %s2710_s29  ;;  %v2453_v35 = vld [vmem:[%s2773_s24 + $0x6c] sm:$0xe]  ;;  %v1736_v37 = vrot.slane %v1734_v28, 4  ;;  %v1735_v43 = vsel %vm2781_vm4, %v2462_v33, %v1734_v28 }
  0xf6   : > { %1352 = vst.msk [vmem:[#allocation2 + $0x1c] sm:$0xf] %vm1344_vm13, %v1311_v46  ;;  %v2463_v45 = vrot.slane %v2453_v35, 9 }
  0xf7   : > { %1221 = vrot.lane.b32.xlu1 %v1187_v42, %s2710_s29  ;;  %v1586_v53 = vpop.permute.xlu0 %1585  ;;  %v2455_v42 = vld [vmem:[%s2773_s24 + $0x74] sm:$0x1]  ;;  %v1738_v46 = vsel %vm2781_vm4, %v1736_v37, %v1737_v38 }
  0xf8   : > { %1630 = vst.msk [vmem:[#allocation2 + $0x10] sm:$0xf] %vm1625_vm14, %v1586_v53  ;;  %v1744_v48 = vrot.slane %v2455_v42, 5  ;;  %v1742_v50 = vsel %vm2781_vm4, %v2463_v45, %v1741_v39 }
  0xf9   : > { %v1588_v60 = vpop.permute.xlu1 %1587  ;;  %1223 = vrot.lane.b32.xlu0 %v1191_v47, %s2710_s29  ;;  %v1743_v47 = vrot.slane %v1741_v39, 4 }
  0xfa   : > { %1631 = vst.msk [vmem:[#allocation2 + $0x14] sm:$0xf] %vm1625_vm14, %v1588_v60 }
  0xfb   : > { %1225 = vrot.lane.b32.xlu1 %v1194_v54, %s2710_s29  ;;  %v1590_v2 = vpop.permute.xlu0 %1589  ;;  %v1745_v52 = vsel %vm2781_vm4, %v1743_v47, %v1744_v48 }
  0xfc   : > { %1632 = vst.msk [vmem:[#allocation2 + $0x18] sm:$0xf] %vm1625_vm14, %v1590_v2 }
  0xfd   : > { %v1592_v8 = vpop.permute.xlu1 %1591  ;;  %1320 = vrot.lane.b32.xlu0 %v2404_v62, %s2711_s30 }
  0xfe   : > { %1633 = vst.msk [vmem:[#allocation2 + $0x1c] sm:$0xf] %vm1625_vm14, %v1592_v8 }
  0xff   : > { %1322 = vrot.lane.b32.xlu1 %v2405_v3, %s2711_s30  ;;  %v1755_v13 = vpop.permute.xlu0 %1754 }
 0x100   : > { %1799 = vst.msk [vmem:[#allocation2 + $0x10] sm:$0xf] %vm1794_vm15, %v1755_v13 }
 0x101   : > { %v1757_v19 = vpop.permute.xlu1 %1756  ;;  %1324 = vrot.lane.b32.xlu0 %v2406_v10, %s2711_s30 }
 0x102   : > { %1800 = vst.msk [vmem:[#allocation2 + $0x14] sm:$0xf] %vm1794_vm15, %v1757_v19 }
 0x103   : > { %1326 = vrot.lane.b32.xlu1 %v2407_v14, %s2711_s30  ;;  %v489_v23 = vpop.permute.xlu0 %488 }
 0x104   : > { %529 = vst.msk [vmem:[#allocation2 + $0x20] sm:$0xf] %vm520_vm8, %v489_v23 }
 0x105   : > { %v491_v29 = vpop.permute.xlu1 %490  ;;  %1601 = vrot.lane.b32.xlu0 %v1542_v21, %s2712_s4 }
 0x106   : > { %530 = vst.msk [vmem:[#allocation2 + $0x24] sm:$0xf] %vm520_vm8, %v491_v29 }
 0x107   : > { %1603 = vrot.lane.b32.xlu1 %v1552_v25, %s2712_s4  ;;  %v1759_v34 = vpop.permute.xlu0 %1758 }
 0x108   : > { %1801 = vst.msk [vmem:[#allocation2 + $0x18] sm:$0xf] %vm1794_vm15, %v1759_v34 }
 0x109   : > { %v1761_v40 = vpop.permute.xlu1 %1760  ;;  %1605 = vrot.lane.b32.xlu0 %v1566_v32, %s2712_s4  ;;  %v2660_v41 = vld [vmem:[#allocation2 + $0x10] sm:$0xff]  }
 0x10a   : > { %1802 = vst.msk [vmem:[#allocation2 + $0x1c] sm:$0xf] %vm1794_vm15, %v1761_v40  ;;  %2586 = vmatprep.mubr.msk.bf16.mxu0 %vm1887_vm0, %v2660_v41 }
 0x10b   : > { %1607 = vrot.lane.b32.xlu1 %v1576_v36, %s2712_s4  ;;  %v493_v44 = vpop.permute.xlu0 %492  ;;  %s214_s4 = scalar_lea.vmem %s3515_s3, %s2304_s28 }
 0x10c   : > { %531 = vst.msk [vmem:[#allocation2 + $0x28] sm:$0xf] %vm520_vm8, %v493_v44 }
 0x10d   : > { %v495_v49 = vpop.permute.xlu1 %494  ;;  %1770 = vrot.lane.b32.xlu0 %v1735_v43, %s2713_s5 }
 0x10e   : > { %532 = vst.msk [vmem:[#allocation2 + $0x2c] sm:$0xf] %vm520_vm8, %v495_v49 }
 0x10f   : > { %1772 = vrot.lane.b32.xlu1 %v1738_v46, %s2713_s5  ;;  %v661_v51 = vpop.permute.xlu0 %660 }
 0x110   : > { %701 = vst.msk [vmem:[#allocation2 + $0x20] sm:$0xf] %vm692_vm9, %v661_v51 }
 0x111   : > { %v663_v53 = vpop.permute.xlu1 %662  ;;  %1774 = vrot.lane.b32.xlu0 %v1742_v50, %s2713_s5  ;;  %v2661_v54 = vld [vmem:[#allocation2 + $0x18] sm:$0xff]  }
 0x112   : > { %702 = vst.msk [vmem:[#allocation2 + $0x24] sm:$0xf] %vm692_vm9, %v663_v53  ;;  %2587 = vmatmul.mubr.msk.bf16.gmra.mxu0 %vm1887_vm0, %v2661_v54 }
 0x113   : > { %1776 = vrot.lane.b32.xlu1 %v1745_v52, %s2713_s5  ;;  %v665_v56 = vpop.permute.xlu0 %664 }
 0x114   : > { %703 = vst.msk [vmem:[#allocation2 + $0x28] sm:$0xf] %vm692_vm9, %v665_v56 }
 0x115   : > { %v667_v57 = vpop.permute.xlu1 %666 }
 0x116   : > { %704 = vst.msk [vmem:[#allocation2 + $0x2c] sm:$0xf] %vm692_vm9, %v667_v57 }
 0x117   : > { %v762_v58 = vpop.permute.xlu0 %761 }
 0x118   : > { %802 = vst.msk [vmem:[#allocation2 + $0x20] sm:$0xf] %vm793_vm10, %v762_v58 }
 0x119   : > { %v764_v4 = vpop.permute.xlu1 %763 }
 0x11a   : > { %803 = vst.msk [vmem:[#allocation2 + $0x24] sm:$0xf] %vm793_vm10, %v764_v4 }
 0x11b   : > { %v766_v59 = vpop.permute.xlu0 %765 }
 0x11c   : > { %804 = vst.msk [vmem:[#allocation2 + $0x28] sm:$0xf] %vm793_vm10, %v766_v59 }
 0x11d   : > { %v768_v60 = vpop.permute.xlu1 %767 }
 0x11e   : > { %805 = vst.msk [vmem:[#allocation2 + $0x2c] sm:$0xf] %vm793_vm10, %v768_v60 }
 0x11f   : > { %v1043_v61 = vpop.permute.xlu0 %1042 }
 0x120   : > { %1083 = vst.msk [vmem:[#allocation2 + $0x20] sm:$0xf] %vm1074_vm11, %v1043_v61 }
 0x121   : > { %v1045_v62 = vpop.permute.xlu1 %1044 }
 0x122   : > { %1084 = vst.msk [vmem:[#allocation2 + $0x24] sm:$0xf] %vm1074_vm11, %v1045_v62 }
 0x123   : > { %v1047_v63 = vpop.permute.xlu0 %1046 }
 0x124   : > { %1085 = vst.msk [vmem:[#allocation2 + $0x28] sm:$0xf] %vm1074_vm11, %v1047_v63 }
 0x125   : > { %v1049_v0 = vpop.permute.xlu1 %1048 }
 0x126   : > { %1086 = vst.msk [vmem:[#allocation2 + $0x2c] sm:$0xf] %vm1074_vm11, %v1049_v0 }
 0x127   : > { %v1212_v1 = vpop.permute.xlu0 %1211 }
 0x128   : > { %1252 = vst.msk [vmem:[#allocation2 + $0x20] sm:$0xf] %vm1243_vm12, %v1212_v1 }
 0x129   : > { %v1214_v2 = vpop.permute.xlu1 %1213 }
 0x12a   : > { %1253 = vst.msk [vmem:[#allocation2 + $0x24] sm:$0xf] %vm1243_vm12, %v1214_v2 }
 0x12b   : > { %v1216_v3 = vpop.permute.xlu0 %1215 }
 0x12c   : > { %1254 = vst.msk [vmem:[#allocation2 + $0x28] sm:$0xf] %vm1243_vm12, %v1216_v3 }
 0x12d   : > { %v1218_v55 = vpop.permute.xlu1 %1217 }
 0x12e   : > { %1255 = vst.msk [vmem:[#allocation2 + $0x2c] sm:$0xf] %vm1243_vm12, %v1218_v55 }
 0x12f   : > { %v1313_v5 = vpop.permute.xlu0 %1312 }
 0x130   : > { %1353 = vst.msk [vmem:[#allocation2 + $0x20] sm:$0xf] %vm1344_vm13, %v1313_v5 }
 0x131   : > { %v1315_v6 = vpop.permute.xlu1 %1314 }
 0x132   : > { %1354 = vst.msk [vmem:[#allocation2 + $0x24] sm:$0xf] %vm1344_vm13, %v1315_v6 }
 0x133   : > { %v1317_v7 = vpop.permute.xlu0 %1316 }
 0x134   : > { %1355 = vst.msk [vmem:[#allocation2 + $0x28] sm:$0xf] %vm1344_vm13, %v1317_v7 }
 0x135   : > { %v1319_v8 = vpop.permute.xlu1 %1318 }
 0x136   : > { %1356 = vst.msk [vmem:[#allocation2 + $0x2c] sm:$0xf] %vm1344_vm13, %v1319_v8 }
 0x137   : > { %v1594_v9 = vpop.permute.xlu0 %1593 }
 0x138   : > { %1634 = vst.msk [vmem:[#allocation2 + $0x20] sm:$0xf] %vm1625_vm14, %v1594_v9 }
 0x139   : > { %v1596_v10 = vpop.permute.xlu1 %1595 }
 0x13a   : > { %1635 = vst.msk [vmem:[#allocation2 + $0x24] sm:$0xf] %vm1625_vm14, %v1596_v10 }
 0x13b   : > { %v1598_v11 = vpop.permute.xlu0 %1597 }
 0x13c   : > { %1636 = vst.msk [vmem:[#allocation2 + $0x28] sm:$0xf] %vm1625_vm14, %v1598_v11 }
 0x13d   : > { %v1600_v12 = vpop.permute.xlu1 %1599 }
 0x13e   : > { %1637 = vst.msk [vmem:[#allocation2 + $0x2c] sm:$0xf] %vm1625_vm14, %v1600_v12 }
 0x13f   : > { %v1763_v13 = vpop.permute.xlu0 %1762 }
 0x140   : > { %1803 = vst.msk [vmem:[#allocation2 + $0x20] sm:$0xf] %vm1794_vm15, %v1763_v13 }
 0x141   : > { %v1765_v14 = vpop.permute.xlu1 %1764 }
 0x142   : > { %1804 = vst.msk [vmem:[#allocation2 + $0x24] sm:$0xf] %vm1794_vm15, %v1765_v14 }
 0x143   : > { %v497_v15 = vpop.permute.xlu0 %496 }
 0x144   : > { %533 = vst.msk [vmem:[#allocation2 + $0x30] sm:$0xf] %vm520_vm8, %v497_v15 }
 0x145   : > { %v499_v16 = vpop.permute.xlu1 %498 }
 0x146   : > { %534 = vst.msk [vmem:[#allocation2 + $0x34] sm:$0xf] %vm520_vm8, %v499_v16 }
 0x147   : > { %v1767_v17 = vpop.permute.xlu0 %1766 }
 0x148   : > { %1805 = vst.msk [vmem:[#allocation2 + $0x28] sm:$0xf] %vm1794_vm15, %v1767_v17 }
 0x149   : > { %v1769_v18 = vpop.permute.xlu1 %1768  ;;  %v2662_v19 = vld [vmem:[#allocation2 + $0x20] sm:$0xff]  }
 0x14a   : > { %1806 = vst.msk [vmem:[#allocation2 + $0x2c] sm:$0xf] %vm1794_vm15, %v1769_v18  ;;  %2590 = vmatprep.mubr.msk.bf16.mxu1 %vm1887_vm0, %v2662_v19 }
 0x14b   : > { %v501_v20 = vpop.permute.xlu0 %500 }
 0x14c   : > { %535 = vst.msk [vmem:[#allocation2 + $0x38] sm:$0xf] %vm520_vm8, %v501_v20 }
 0x14d   : > { %v503_v21 = vpop.permute.xlu1 %502 }
 0x14e   : > { %536 = vst.msk [vmem:[#allocation2 + $0x3c] sm:$0xf] %vm520_vm8, %v503_v21 }
 0x14f   : > { %v669_v22 = vpop.permute.xlu0 %668 }
 0x150   : > { %705 = vst.msk [vmem:[#allocation2 + $0x30] sm:$0xf] %vm692_vm9, %v669_v22 }
 0x151   : > { %v671_v23 = vpop.permute.xlu1 %670  ;;  %v2663_v24 = vld [vmem:[#allocation2 + $0x28] sm:$0xff]  }
 0x152   : > { %706 = vst.msk [vmem:[#allocation2 + $0x34] sm:$0xf] %vm692_vm9, %v671_v23  ;;  %2591 = vmatmul.mubr.msk.bf16.vlgmr.msra.gmra.mxu1 %vm1887_vm0, %v2663_v24 }
 0x153   : > { %v673_v25 = vpop.permute.xlu0 %672 }
 0x154   : > { %707 = vst.msk [vmem:[#allocation2 + $0x38] sm:$0xf] %vm692_vm9, %v673_v25 }
 0x155   : > { %v675_v26 = vpop.permute.xlu1 %674 }
 0x156   : > { %708 = vst.msk [vmem:[#allocation2 + $0x3c] sm:$0xf] %vm692_vm9, %v675_v26 }
 0x157   : > { %v770_v27 = vpop.permute.xlu0 %769 }
 0x158   : > { %806 = vst.msk [vmem:[#allocation2 + $0x30] sm:$0xf] %vm793_vm10, %v770_v27 }
 0x159   : > { %v772_v28 = vpop.permute.xlu1 %771 }
 0x15a   : > { %807 = vst.msk [vmem:[#allocation2 + $0x34] sm:$0xf] %vm793_vm10, %v772_v28 }
 0x15b   : > { %v774_v29 = vpop.permute.xlu0 %773 }
 0x15c   : > { %808 = vst.msk [vmem:[#allocation2 + $0x38] sm:$0xf] %vm793_vm10, %v774_v29 }
 0x15d   : > { %v776_v30 = vpop.permute.xlu1 %775 }
 0x15e   : > { %809 = vst.msk [vmem:[#allocation2 + $0x3c] sm:$0xf] %vm793_vm10, %v776_v30 }
 0x15f   : > { %v1051_v31 = vpop.permute.xlu0 %1050 }
 0x160   : > { %1087 = vst.msk [vmem:[#allocation2 + $0x30] sm:$0xf] %vm1074_vm11, %v1051_v31 }
 0x161   : > { %v1053_v32 = vpop.permute.xlu1 %1052 }
 0x162   : > { %1088 = vst.msk [vmem:[#allocation2 + $0x34] sm:$0xf] %vm1074_vm11, %v1053_v32 }
 0x163   : > { %v1055_v33 = vpop.permute.xlu0 %1054 }
 0x164   : > { %1089 = vst.msk [vmem:[#allocation2 + $0x38] sm:$0xf] %vm1074_vm11, %v1055_v33 }
 0x165   : > { %v1057_v34 = vpop.permute.xlu1 %1056 }
 0x166   : > { %1090 = vst.msk [vmem:[#allocation2 + $0x3c] sm:$0xf] %vm1074_vm11, %v1057_v34 }
 0x167   : > { %v1220_v35 = vpop.permute.xlu0 %1219 }
 0x168   : > { %1256 = vst.msk [vmem:[#allocation2 + $0x30] sm:$0xf] %vm1243_vm12, %v1220_v35 }
 0x169   : > { %v1222_v36 = vpop.permute.xlu1 %1221 }
 0x16a   : > { %1257 = vst.msk [vmem:[#allocation2 + $0x34] sm:$0xf] %vm1243_vm12, %v1222_v36 }
 0x16b   : > { %v1224_v37 = vpop.permute.xlu0 %1223 }
 0x16c   : > { %1258 = vst.msk [vmem:[#allocation2 + $0x38] sm:$0xf] %vm1243_vm12, %v1224_v37 }
 0x16d   : > { %v1226_v38 = vpop.permute.xlu1 %1225 }
 0x16e   : > { %1259 = vst.msk [vmem:[#allocation2 + $0x3c] sm:$0xf] %vm1243_vm12, %v1226_v38 }
 0x16f   : > { %v1321_v39 = vpop.permute.xlu0 %1320 }
 0x170   : > { %1357 = vst.msk [vmem:[#allocation2 + $0x30] sm:$0xf] %vm1344_vm13, %v1321_v39 }
 0x171   : > { %v1323_v40 = vpop.permute.xlu1 %1322 }
 0x172   : > { %1358 = vst.msk [vmem:[#allocation2 + $0x34] sm:$0xf] %vm1344_vm13, %v1323_v40 }
 0x173   : > { %v1325_v41 = vpop.permute.xlu0 %1324 }
 0x174   : > { %1359 = vst.msk [vmem:[#allocation2 + $0x38] sm:$0xf] %vm1344_vm13, %v1325_v41 }
 0x175   : > { %v1327_v42 = vpop.permute.xlu1 %1326 }
 0x176   : > { %1360 = vst.msk [vmem:[#allocation2 + $0x3c] sm:$0xf] %vm1344_vm13, %v1327_v42 }
 0x177   : > { %v1602_v43 = vpop.permute.xlu0 %1601 }
 0x178   : > { %1638 = vst.msk [vmem:[#allocation2 + $0x30] sm:$0xf] %vm1625_vm14, %v1602_v43 }
 0x179   : > { %v1604_v45 = vpop.permute.xlu1 %1603 }
 0x17a   : > { %1639 = vst.msk [vmem:[#allocation2 + $0x34] sm:$0xf] %vm1625_vm14, %v1604_v45 }
 0x17b   : > { %v1606_v44 = vpop.permute.xlu0 %1605 }
 0x17c   : > { %1640 = vst.msk [vmem:[#allocation2 + $0x38] sm:$0xf] %vm1625_vm14, %v1606_v44 }
 0x17d   : > { %v1608_v46 = vpop.permute.xlu1 %1607 }
 0x17e   : > { %1641 = vst.msk [vmem:[#allocation2 + $0x3c] sm:$0xf] %vm1625_vm14, %v1608_v46 }
 0x17f   : > { %v1771_v47 = vpop.permute.xlu0 %1770 }
 0x180   : > { %1807 = vst.msk [vmem:[#allocation2 + $0x30] sm:$0xf] %vm1794_vm15, %v1771_v47 }
 0x181   : > { %v1773_v48 = vpop.permute.xlu1 %1772 }
 0x182   : > { %1808 = vst.msk [vmem:[#allocation2 + $0x34] sm:$0xf] %vm1794_vm15, %v1773_v48 }
 0x183   : > { %v1775_v49 = vpop.permute.xlu0 %1774 }
 0x184   : > { %1809 = vst.msk [vmem:[#allocation2 + $0x38] sm:$0xf] %vm1794_vm15, %v1775_v49 }
 0x185   : > { %v1777_v50 = vpop.permute.xlu1 %1776 }
 0x186   : > { %1810 = vst.msk [vmem:[#allocation2 + $0x3c] sm:$0xf] %vm1794_vm15, %v1777_v50 }
 0x189   : > { %v2664_v51 = vld [vmem:[#allocation2 + $0x30] sm:$0xff]  }
 0x18a   : > { %2594 = vmatprep.mubr.msk.bf16.mxu1 %vm1887_vm0, %v2664_v51 }
 0x18d   : > { %v2665_v52 = vld [vmem:[#allocation2 + $0x38] sm:$0xff]  }
 0x18e   : > { %2595 = vmatmul.mubr.msk.bf16.gmra.mxu1 %vm1887_vm0, %v2665_v52 }
 0x192   : > { %v2584_v53 = vpop.f32.mrf.mxu0 }
 0x193   : > { %v2037_v62 = vmul.f32 %v2584_v53, %v2584_v53 }
 0x194   : > { %v1950_v54 = vpop.f32.mrf.mxu0 }
 0x195   : > { %v2035_v4 = vmul.f32 %v1950_v54, %v1950_v54 }
 0x196   : > { %v2585_v56 = vpop.f32.mrf.mxu0 }
 0x197   : > { %v2526_v57 = vpack.c.bf16 %v2585_v56, %v2584_v53  ;;  %v2038_v1 = vmul.f32 %v2585_v56, %v2585_v56 }
 0x198   : > { %v1953_v58 = vpop.f32.mrf.mxu0 }
 0x199   : > { %2558 = vst [vmem:[%s3481_s25 + $0x8] sm:$0xff] %v2526_v57   ;;  %v2013_v59 = vadd.f32 %v1953_v58, %v1950_v54  ;;  %v2036_v60 = vmul.f32 %v1953_v58, %v1953_v58  ;;  %v2521_v61 = vpack.c.bf16 %v1953_v58, %v1950_v54 }
 0x19b   : > { %v2014_v63 = vadd.f32 %v2584_v53, %v2013_v59  ;;  %v2051_v0 = vadd.f32 %v2036_v60, %v2035_v4  ;;  %2522 = vst [vmem:[%s3481_s25] sm:$0xff] %v2521_v61  }
 0x19d   : > { %v2052_v2 = vadd.f32 %v2051_v0, %v2037_v62  ;;  %v2015_v3 = vadd.f32 %v2585_v56, %v2014_v63 }
 0x19f   : > { %v2053_v55 = vadd.f32 %v2052_v2, %v2038_v1 }
 0x1d2   : > { %v2588_v5 = vpop.f32.mrf.mxu0 }
 0x1d3   : > { %v2041_v16 = vmul.f32 %v2588_v5, %v2588_v5 }
 0x1d4   : > { %v1966_v6 = vpop.f32.mrf.mxu0 }
 0x1d5   : > { %v2016_v7 = vadd.f32 %v2015_v3, %v1966_v6  ;;  %v2039_v8 = vmul.f32 %v1966_v6, %v1966_v6 }
 0x1d6   : > { %v2589_v9 = vpop.f32.mrf.mxu0 }
 0x1d7   : > { %v2054_v10 = vadd.f32 %v2053_v55, %v2039_v8  ;;  %v2536_v11 = vpack.c.bf16 %v2589_v9, %v2588_v5  ;;  %v2042_v19 = vmul.f32 %v2589_v9, %v2589_v9 }
 0x1d8   : > { %v1969_v12 = vpop.f32.mrf.mxu0 }
 0x1d9   : > { %2560 = vst [vmem:[%s3481_s25 + $0x18] sm:$0xff] %v2536_v11   ;;  %v2017_v13 = vadd.f32 %v2016_v7, %v1969_v12  ;;  %v2040_v14 = vmul.f32 %v1969_v12, %v1969_v12  ;;  %v2531_v15 = vpack.c.bf16 %v1969_v12, %v1966_v6 }
 0x1db   : > { %v2018_v17 = vadd.f32 %v2588_v5, %v2017_v13  ;;  %v2055_v18 = vadd.f32 %v2054_v10, %v2040_v14  ;;  %2559 = vst [vmem:[%s3481_s25 + $0x10] sm:$0xff] %v2531_v15  }
 0x1dd   : > { %v2056_v20 = vadd.f32 %v2055_v18, %v2041_v16  ;;  %v2019_v21 = vadd.f32 %v2589_v9, %v2018_v17 }
 0x1df   : > { %v2057_v22 = vadd.f32 %v2056_v20, %v2042_v19 }
 0x212   : > { %v2592_v23 = vpop.f32.mrf.mxu1 }
 0x213   : > { %v2045_v35 = vmul.f32 %v2592_v23, %v2592_v23 }
 0x214   : > { %v1982_v24 = vpop.f32.mrf.mxu1 }
 0x215   : > { %v2043_v29 = vmul.f32 %v1982_v24, %v1982_v24  ;;  %v2020_v30 = vadd.f32 %v2019_v21, %v1982_v24 }
 0x216   : > { %v2593_v25 = vpop.f32.mrf.mxu1 }
 0x217   : > { %v2546_v26 = vpack.c.bf16 %v2593_v25, %v2592_v23  ;;  %v2058_v32 = vadd.f32 %v2057_v22, %v2043_v29  ;;  %v2046_v40 = vmul.f32 %v2593_v25, %v2593_v25 }
 0x218   : > { %v1985_v27 = vpop.f32.mrf.mxu1 }
 0x219   : > { %2562 = vst [vmem:[%s3481_s25 + $0x28] sm:$0xff] %v2546_v26   ;;  %v2541_v28 = vpack.c.bf16 %v1985_v27, %v1982_v24  ;;  %v2044_v31 = vmul.f32 %v1985_v27, %v1985_v27  ;;  %v2021_v33 = vadd.f32 %v2020_v30, %v1985_v27 }
 0x21b   : > { %2561 = vst [vmem:[%s3481_s25 + $0x20] sm:$0xff] %v2541_v28   ;;  %v2059_v34 = vadd.f32 %v2058_v32, %v2044_v31  ;;  %v2022_v36 = vadd.f32 %v2592_v23, %v2021_v33 }
 0x21d   : > { %v2060_v38 = vadd.f32 %v2059_v34, %v2045_v35  ;;  %v2023_v41 = vadd.f32 %v2593_v25, %v2022_v36 }
 0x21f   : > { %v2061_v44 = vadd.f32 %v2060_v38, %v2046_v40 }
 0x24e   : > { %v2596_v37 = vpop.f32.mrf.mxu1 }
 0x24f   : > { %v2049_v52 = vmul.f32 %v2596_v37, %v2596_v37 }
 0x250   : > { %v1998_v39 = vpop.f32.mrf.mxu1 }
 0x251   : > { %v2047_v42 = vmul.f32 %v1998_v39, %v1998_v39  ;;  %v2024_v45 = vadd.f32 %v2023_v41, %v1998_v39 }
 0x252   : > { %v2597_v43 = vpop.f32.mrf.mxu1 }
 0x253   : > { %v2556_v46 = vpack.c.bf16 %v2597_v43, %v2596_v37  ;;  %v2062_v48 = vadd.f32 %v2061_v44, %v2047_v42  ;;  %v2050_v56 = vmul.f32 %v2597_v43, %v2597_v43 }
 0x254   : > { %v2001_v47 = vpop.f32.mrf.mxu1 }
 0x255   : > { %2564 = vst [vmem:[%s3481_s25 + $0x38] sm:$0xff] %v2556_v46   ;;  %v2025_v49 = vadd.f32 %v2024_v45, %v2001_v47  ;;  %v2048_v50 = vmul.f32 %v2001_v47, %v2001_v47  ;;  %v2551_v51 = vpack.c.bf16 %v2001_v47, %v1998_v39 }
 0x257   : > { %v2026_v53 = vadd.f32 %v2596_v37, %v2025_v49  ;;  %v2063_v54 = vadd.f32 %v2062_v48, %v2048_v50  ;;  %2563 = vst [vmem:[%s3481_s25 + $0x30] sm:$0xff] %v2551_v51  }
 0x259   : > { %v2027_v57 = vadd.f32 %v2597_v43, %v2026_v53  ;;  %v2064_v58 = vadd.f32 %v2063_v54, %v2049_v52 }
 0x25b   : > { %v2028_v4 = vrot.slane %v2027_v57, 4  ;;  %v2065_v59 = vadd.f32 %v2064_v58, %v2050_v56 }
 0x25d   : > { %v2029_v60 = vadd.f32 %v2028_v4, %v2027_v57  ;;  %v2066_v61 = vrot.slane %v2065_v59, 4 }
 0x25f   : > { %v2030_v62 = vrot.slane %v2029_v60, 2  ;;  %v2067_v63 = vadd.f32 %v2066_v61, %v2065_v59 }
 0x261   : > { %v2031_v0 = vadd.f32 %v2030_v62, %v2029_v60  ;;  %v2068_v1 = vrot.slane %v2067_v63, 2 }
 0x263   : > { %v2032_v2 = vrot.slane %v2031_v0, 1  ;;  %v2069_v3 = vadd.f32 %v2068_v1, %v2067_v63 }
 0x265   : > { %v2033_v55 = vadd.f32 %v2032_v2, %v2031_v0  ;;  %v2070_v5 = vrot.slane %v2069_v3, 1 }
 0x267   : > { %2034 = vst [vmem:[%s214_s4] sm:$0x1] %v2033_v55  ;;  %v2071_v6 = vadd.f32 %v2070_v5, %v2069_v3 }
 0x269   : > { %2072 = vst [vmem:[%s214_s4 + $0x1] sm:$0x1] %v2071_v6 }
 0x26a PF: > { %s14_s16 = sadd.s32 1, %s2704_s16   ;;  %s3520_s12 = smov %s2696_s14 }
 0x26b   : > { %p11_p8 = scmp.ge.s32.totalorder %s14_s16, 6   ;;  %s3521_s13 = smov %s2700_s15 }
 0x26c   : > { %s3522_s14 = smov %s3525_s17  ;;  %s3523_s15 = smov %s3529_s18 }
 0x26d   :  { %13 = sbr.rel (!%p11_p8) target bundleno = 3 (0x3), region = 73 }

</bundles_post_ra>
